<compile_context>
chip_gen: v6e
topology: v6e:2x2x1
jax: 0.10.0
libtpu: 0.0.40
codegen_flags: <defaults>
</compile_context>

<pallas_src>
import functools

import jax
import jax.numpy as jnp
from jax.experimental import pallas as pl
from jax.experimental.pallas import tpu as pltpu


def _round_up(x, m):
    return (x + m - 1) // m * m


def _supcon_kernel(gid_row_ref, gid_col_ref, feat_row_ref, feat_col_ref,
                   loss_ref, m_sc, l_sc, p_sc, c_sc, *,
                   inv_temp, loss_scale, n_valid, block_r, block_c):
    i = pl.program_id(0)          # anchor (row) tile            -> "parallel"
    j = pl.program_id(1)          # contrast (column) tile       -> reduction

    @pl.when(j == 0)
    def _init():
        m_sc[...] = jnp.full((block_r, 1), -jnp.inf, dtype=jnp.float32)
        l_sc[...] = jnp.zeros((block_r, 1), dtype=jnp.float32)
        p_sc[...] = jnp.zeros((block_r, 1), dtype=jnp.float32)
        c_sc[...] = jnp.zeros((block_r, 1), dtype=jnp.float32)

    # (block_r, D) x (block_c, D) contracted on D -> (block_r, block_c) on the
    # MXU; 1/temperature folded into the smaller row operand (no N^2 divide).
    f_r = feat_row_ref[...] * inv_temp
    f_c = feat_col_ref[...]
    sim = jax.lax.dot_general(f_r, f_c, (((1,), (1,)), ((), ())),
                              preferred_element_type=jnp.float32)

    # Rebuild masks from indices + group ids (zero N^2 mask traffic).
    row_ids = i * block_r + jax.lax.broadcasted_iota(jnp.int32, (block_r, block_c), 0)
    col_ids = j * block_c + jax.lax.broadcasted_iota(jnp.int32, (block_r, block_c), 1)
    col_valid = col_ids < n_valid
    logits_mask = jnp.logical_and(col_valid, row_ids != col_ids)   # drop self-contrast
    pos_mask = jnp.logical_and(gid_row_ref[...] == gid_col_ref[...], logits_mask)

    # Online max / exp-sum over the contrast axis. The diagonal is included in
    # the max but excluded from the exp sum (matches the PyTorch reference).
    sim_for_max = jnp.where(col_valid, sim, -jnp.inf)
    m_new = jnp.maximum(m_sc[...], jnp.max(sim_for_max, axis=1, keepdims=True))
    rescale = jnp.exp(m_sc[...] - m_new)
    e = jnp.where(logits_mask, jnp.exp(sim - m_new), 0.0)
    l_sc[...] = rescale * l_sc[...] + jnp.sum(e, axis=1, keepdims=True)
    m_sc[...] = m_new

    # sum(mask * sim) and sum(mask) are linear in the columns -> plain sums.
    p_sc[...] = p_sc[...] + jnp.sum(jnp.where(pos_mask, sim, 0.0), axis=1, keepdims=True)
    c_sc[...] = c_sc[...] + jnp.sum(pos_mask.astype(jnp.float32), axis=1, keepdims=True)

    @pl.when(j == pl.num_programs(1) - 1)
    def _finalize():
        cnt = c_sc[...]
        # sum(mask * log_prob) / sum(mask)
        #   = (sum(mask*sim) - max*sum(mask)) / sum(mask) - log(sum(exp) + 1e-6)
        mean_log_prob_pos = ((p_sc[...] - m_sc[...] * cnt) / jnp.maximum(cnt, 1.0)
                             - jnp.log(l_sc[...] + 1e-6))
        row_idx = i * block_r + jax.lax.broadcasted_iota(jnp.int32, (block_r, 1), 0)
        loss_ref[...] = jnp.where(row_idx < n_valid,
                                  -loss_scale * mean_log_prob_pos, 0.0)


def supcon_loss(features, labels=None, mask=None, *, temperature=0.07,
                contrast_mode='all', base_temperature=0.07):
    """JAX/Pallas port of SupConLoss.forward."""
    features = jnp.asarray(features)
    if features.ndim < 3:
        raise ValueError('`features` needs to be [bsz, n_views, ...], '
                         'at least 3 dimensions are required')
    if features.ndim > 3:
        features = features.reshape(features.shape[0], features.shape[1], -1)
    bsz, n_views, dim = features.shape
    n = bsz * n_views

    if labels is not None and mask is not None:
        raise ValueError('Cannot define both `labels` and `mask`')
    if mask is not None:
        # TODO(synk): arbitrary user-supplied dense `mask` path not implemented
        # (the kernel rebuilds masks from compact per-row group ids).
        raise NotImplementedError('explicit `mask` argument is not supported')
    if contrast_mode not in ('all', 'one'):
        raise ValueError('Unknown mode: {}'.format(contrast_mode))

    if labels is not None:
        labels = jnp.asarray(labels).reshape(-1)
        if labels.shape[0] != bsz:
            raise ValueError('Num of labels does not match num of features')
        base_gid = labels.astype(jnp.int32)
    else:
        base_gid = jnp.arange(bsz, dtype=jnp.int32)   # SimCLR: positives = other views

    # contrast_feature = torch.cat(torch.unbind(features, dim=1), dim=0)
    # (view-major ordering); native dtype, no extra upcast.
    contrast = jnp.swapaxes(features, 0, 1).reshape(n, dim)
    gids = jnp.tile(base_gid, n_views)                # row r <-> sample r % bsz

    # Tile sizes (multiples of (8, 128)); pad N and D accordingly.
    n128 = _round_up(n, 128)
    if n128 >= 512:
        block_c = 512
    elif n128 >= 256:
        block_c = 256
    else:
        block_c = 128
    block_r = min(256, block_c)                       # block_r | block_c
    n_pad = _round_up(n, block_c)
    d_pad = _round_up(dim, 128)

    feat_p = jnp.pad(contrast, ((0, n_pad - n), (0, d_pad - dim)))
    gids_p = jnp.pad(gids, (0, n_pad - n), constant_values=-1)
    gid_row = gids_p.reshape(n_pad, 1)
    gid_col = gids_p.reshape(1, n_pad)

    kernel = functools.partial(
        _supcon_kernel,
        inv_temp=float(1.0 / temperature),
        loss_scale=float(temperature / base_temperature),
        n_valid=n, block_r=block_r, block_c=block_c)

    grid = (n_pad // block_r, n_pad // block_c)
    per_row = pl.pallas_call(
        kernel,
        out_shape=jax.ShapeDtypeStruct((n_pad, 1), jnp.float32),
        grid_spec=pltpu.PrefetchScalarGridSpec(
            num_scalar_prefetch=0,
            grid=grid,
            in_specs=[
                pl.BlockSpec((block_r, 1), lambda i, j: (i, 0)),       # group ids (rows)
                pl.BlockSpec((1, block_c), lambda i, j: (0, j)),       # group ids (cols)
                pl.BlockSpec((block_r, d_pad), lambda i, j: (i, 0)),   # anchor tile
                pl.BlockSpec((block_c, d_pad), lambda i, j: (j, 0)),   # contrast tile
            ],
            out_specs=pl.BlockSpec((block_r, 1), lambda i, j: (i, 0)),
            scratch_shapes=[pltpu.VMEM((block_r, 1), jnp.float32)] * 4,
        ),
        compiler_params=pltpu.CompilerParams(
            dimension_semantics=("parallel", "arbitrary"),
            vmem_limit_bytes=32 * 1024 * 1024,
        ),
    )(gid_row, gid_col, feat_p, feat_p)

    if contrast_mode == 'one':
        # Anchors are only the first view = rows [0, bsz) in view-major layout.
        # TODO(synk): rows [bsz, N) are still computed by the kernel and discarded.
        return jnp.sum(per_row[:bsz]) / bsz
    return jnp.sum(per_row) / n


def _supcon_ref(features, labels=None, *, temperature=0.07, base_temperature=0.07):
    """Pure-JAX reference mirroring the PyTorch code (contrast_mode='all')."""
    bsz, n_views, _ = features.shape
    n = bsz * n_views
    contrast = jnp.swapaxes(features, 0, 1).reshape(n, -1).astype(jnp.float32)
    sim = jnp.dot(contrast, contrast.T,
                  precision=jax.lax.Precision.HIGHEST) / temperature
    logits = sim - jnp.max(sim, axis=1, keepdims=True)
    if labels is None:
        base = jnp.eye(bsz, dtype=jnp.float32)
    else:
        l = labels.reshape(-1, 1)
        base = (l == l.T).astype(jnp.float32)
    mask = jnp.tile(base, (n_views, n_views))
    lmask = 1.0 - jnp.eye(n, dtype=jnp.float32)
    mask = mask * lmask
    exp_logits = jnp.exp(logits) * lmask
    log_prob = logits - jnp.log(jnp.sum(exp_logits, axis=1, keepdims=True) + 1e-6)
    mean_log_prob_pos = jnp.sum(mask * log_prob, axis=1) / jnp.sum(mask, axis=1)
    return jnp.mean(-(temperature / base_temperature) * mean_log_prob_pos)


if __name__ == "__main__":
    key = jax.random.PRNGKey(0)
    k1, k2 = jax.random.split(key)

    # Small test: SimCLR path (labels=None) and supervised path (labels given).
    bsz, n_views, dim = 4, 2, 32
    feats = jax.random.normal(k1, (bsz, n_views, dim), dtype=jnp.float32)
    feats = feats / jnp.linalg.norm(feats, axis=-1, keepdims=True)

    loss = supcon_loss(feats)
    jax.block_until_ready(loss)
    ref = _supcon_ref(feats)
    assert jnp.allclose(loss, ref, atol=1e-4, rtol=1e-4), (loss, ref)

    labels = jnp.array([0, 1, 0, 1], dtype=jnp.int32)
    loss_l = supcon_loss(feats, labels=labels)
    jax.block_until_ready(loss_l)
    ref_l = _supcon_ref(feats, labels=labels)
    assert jnp.allclose(loss_l, ref_l, atol=1e-4, rtol=1e-4), (loss_l, ref_l)

    # Larger test: exercises the multi-tile grid (N=576 -> padded 1024,
    # grid=(4, 2)), N/D padding and the online-softmax accumulation.
    bsz2, n_views2, dim2 = 288, 2, 40
    feats2 = jax.random.normal(k2, (bsz2, n_views2, dim2), dtype=jnp.float32)
    feats2 = feats2 / jnp.linalg.norm(feats2, axis=-1, keepdims=True)
    labels2 = (jnp.arange(bsz2) % 6).astype(jnp.int32)

    loss2 = supcon_loss(feats2, labels=labels2)
    jax.block_until_ready(loss2)
    ref2 = _supcon_ref(feats2, labels=labels2)
    assert jnp.allclose(loss2, ref2, atol=1e-3, rtol=1e-3), (loss2, ref2)

    print("KERNEL_OK")
</pallas_src>

<mosaic_0001>
module attributes {stable_mosaic.version = 11 : i64} {
  func.func @_supcon_kernel(%arg0: i32, %arg1: i32, %arg2: memref<128x1xi32, #tpu.memory_space<vmem>>, %arg3: memref<1x128xi32, #tpu.memory_space<vmem>>, %arg4: memref<128x128xf32, #tpu.memory_space<vmem>>, %arg5: memref<128x128xf32, #tpu.memory_space<vmem>>, %arg6: memref<128x1xf32, #tpu.memory_space<vmem>>, %arg7: memref<128x1xf32, #tpu.memory_space<vmem>>, %arg8: memref<128x1xf32, #tpu.memory_space<vmem>>, %arg9: memref<128x1xf32, #tpu.memory_space<vmem>>, %arg10: memref<128x1xf32, #tpu.memory_space<vmem>>) attributes {dimension_semantics = [#tpu.dimension_semantics<parallel>, #tpu.dimension_semantics<arbitrary>], iteration_bounds = array<i64: 1, 1>, scalar_prefetch = 0 : i64, scratch_operands = 4 : i64, tpu.core_type = #tpu.core_type<tc>, window_params = [{transform_indices = @transform_0, window_bounds = array<i64: 128, 1>}, {transform_indices = @transform_1, window_bounds = array<i64: 1, 128>}, {transform_indices = @transform_2, window_bounds = array<i64: 128, 128>}, {transform_indices = @transform_3, window_bounds = array<i64: 128, 128>}, {transform_indices = @transform_4, window_bounds = array<i64: 128, 1>}]} {
    %c0_i32 = arith.constant 0 : i32
    %0 = arith.cmpi eq, %arg1, %c0_i32 : i32
    %1 = arith.extui %0 : i1 to i32
    %c0_i32_0 = arith.constant 0 : i32
    %2 = arith.cmpi ne, %1, %c0_i32_0 : i32
    scf.if %2 {
      %cst_37 = arith.constant 0xFF800000 : f32
      %64 = vector.broadcast %cst_37 : f32 to vector<128x1xf32>
      %c0_38 = arith.constant 0 : index
      %c0_39 = arith.constant 0 : index
      %65 = vector.load %arg7[%c0_38, %c0_39] : memref<128x1xf32, #tpu.memory_space<vmem>>, vector<128x1xf32>
      tpu.vector_store %arg7[%c0_38, %c0_39], %64 {strides = array<i32>} : memref<128x1xf32, #tpu.memory_space<vmem>>, vector<128x1xf32>,
      %cst_40 = arith.constant 0.000000e+00 : f32
      %66 = vector.broadcast %cst_40 : f32 to vector<128x1xf32>
      %c0_41 = arith.constant 0 : index
      %c0_42 = arith.constant 0 : index
      %67 = vector.load %arg8[%c0_41, %c0_42] : memref<128x1xf32, #tpu.memory_space<vmem>>, vector<128x1xf32>
      tpu.vector_store %arg8[%c0_41, %c0_42], %66 {strides = array<i32>} : memref<128x1xf32, #tpu.memory_space<vmem>>, vector<128x1xf32>,
      %cst_43 = arith.constant 0.000000e+00 : f32
      %68 = vector.broadcast %cst_43 : f32 to vector<128x1xf32>
      %c0_44 = arith.constant 0 : index
      %c0_45 = arith.constant 0 : index
      %69 = vector.load %arg9[%c0_44, %c0_45] : memref<128x1xf32, #tpu.memory_space<vmem>>, vector<128x1xf32>
      tpu.vector_store %arg9[%c0_44, %c0_45], %68 {strides = array<i32>} : memref<128x1xf32, #tpu.memory_space<vmem>>, vector<128x1xf32>,
      %cst_46 = arith.constant 0.000000e+00 : f32
      %70 = vector.broadcast %cst_46 : f32 to vector<128x1xf32>
      %c0_47 = arith.constant 0 : index
      %c0_48 = arith.constant 0 : index
      %71 = vector.load %arg10[%c0_47, %c0_48] : memref<128x1xf32, #tpu.memory_space<vmem>>, vector<128x1xf32>
      tpu.vector_store %arg10[%c0_47, %c0_48], %70 {strides = array<i32>} : memref<128x1xf32, #tpu.memory_space<vmem>>, vector<128x1xf32>,
    } else {
    }
    %c0 = arith.constant 0 : index
    %c0_1 = arith.constant 0 : index
    %3 = vector.load %arg4[%c0, %c0_1] : memref<128x128xf32, #tpu.memory_space<vmem>>, vector<128x128xf32>
    %cst = arith.constant 14.2857141 : f32
    %4 = vector.broadcast %cst : f32 to vector<128x128xf32>
    %5 = arith.mulf %3, %4 : vector<128x128xf32>
    %c0_2 = arith.constant 0 : index
    %c0_3 = arith.constant 0 : index
    %6 = vector.load %arg5[%c0_2, %c0_3] : memref<128x128xf32, #tpu.memory_space<vmem>>, vector<128x128xf32>
    %cst_4 = arith.constant dense<0.000000e+00> : vector<128x128xf32>
    %7 = tpu.matmul %5, %6, %cst_4 {dimension_numbers = #tpu.dot_dimension_numbers<[1], [1], [0], [0], [0, 0, 1, 0], [], []>} : vector<128x128xf32>, vector<128x128xf32>, vector<128x128xf32> -> vector<128x128xf32>
    %c128_i32 = arith.constant 128 : i32
    %8 = arith.muli %arg0, %c128_i32 : i32
    %9 = tpu.iota {dimensions = array<i32: 0>} : vector<128x128xi32>
    %10 = vector.broadcast %8 : i32 to vector<128x128xi32>
    %11 = arith.addi %10, %9 : vector<128x128xi32>
    %c128_i32_5 = arith.constant 128 : i32
    %12 = arith.muli %arg1, %c128_i32_5 : i32
    %13 = tpu.iota {dimensions = array<i32: 1>} : vector<128x128xi32>
    %14 = vector.broadcast %12 : i32 to vector<128x128xi32>
    %15 = arith.addi %14, %13 : vector<128x128xi32>
    %c8_i32 = arith.constant 8 : i32
    %16 = vector.broadcast %c8_i32 : i32 to vector<128x128xi32>
    %17 = arith.cmpi slt, %15, %16 : vector<128x128xi32>
    %18 = arith.cmpi ne, %11, %15 : vector<128x128xi32>
    %19 = arith.andi %17, %18 : vector<128x128xi1>
    %c0_6 = arith.constant 0 : index
    %c0_7 = arith.constant 0 : index
    %20 = vector.load %arg2[%c0_6, %c0_7] : memref<128x1xi32, #tpu.memory_space<vmem>>, vector<128x1xi32>
    %c0_8 = arith.constant 0 : index
    %c0_9 = arith.constant 0 : index
    %21 = vector.load %arg3[%c0_8, %c0_9] : memref<1x128xi32, #tpu.memory_space<vmem>>, vector<1x128xi32>
    %22 = vector.broadcast %20 : vector<128x1xi32> to vector<128x128xi32>
    %23 = vector.broadcast %21 : vector<1x128xi32> to vector<128x128xi32>
    %24 = arith.cmpi eq, %22, %23 : vector<128x128xi32>
    %25 = arith.andi %24, %19 : vector<128x128xi1>
    %cst_10 = arith.constant 0xFF800000 : f32
    %26 = vector.broadcast %cst_10 : f32 to vector<128x128xf32>
    %27 = arith.select %17, %7, %26 : vector<128x128xi1>, vector<128x128xf32>
    %c0_11 = arith.constant 0 : index
    %c0_12 = arith.constant 0 : index
    %28 = vector.load %arg7[%c0_11, %c0_12] : memref<128x1xf32, #tpu.memory_space<vmem>>, vector<128x1xf32>
    %cst_13 = arith.constant dense<0xFF800000> : vector<128xf32>
    %29 = vector.multi_reduction <maximumf>, %27, %cst_13 [1] : vector<128x128xf32> to vector<128xf32>
    %30 = vector.shape_cast %29 : vector<128xf32> to vector<128x1xf32>
    %31 = arith.maximumf %28, %30 : vector<128x1xf32>
    %c0_14 = arith.constant 0 : index
    %c0_15 = arith.constant 0 : index
    %32 = vector.load %arg7[%c0_14, %c0_15] : memref<128x1xf32, #tpu.memory_space<vmem>>, vector<128x1xf32>
    %33 = arith.subf %32, %31 : vector<128x1xf32>
    %34 = math.exp %33 : vector<128x1xf32>
    %35 = vector.broadcast %31 : vector<128x1xf32> to vector<128x128xf32>
    %36 = arith.subf %7, %35 : vector<128x128xf32>
    %37 = math.exp %36 : vector<128x128xf32>
    %cst_16 = arith.constant 0.000000e+00 : f32
    %38 = vector.broadcast %cst_16 : f32 to vector<128x128xf32>
    %39 = arith.select %19, %37, %38 : vector<128x128xi1>, vector<128x128xf32>
    %c0_17 = arith.constant 0 : index
    %c0_18 = arith.constant 0 : index
    %40 = vector.load %arg8[%c0_17, %c0_18] : memref<128x1xf32, #tpu.memory_space<vmem>>, vector<128x1xf32>
    %41 = arith.mulf %34, %40 : vector<128x1xf32>
    %cst_19 = arith.constant dense<0.000000e+00> : vector<128xf32>
    %42 = vector.multi_reduction <add>, %39, %cst_19 [1] : vector<128x128xf32> to vector<128xf32>
    %43 = vector.shape_cast %42 : vector<128xf32> to vector<128x1xf32>
    %44 = arith.addf %41, %43 : vector<128x1xf32>
    %c0_20 = arith.constant 0 : index
    %c0_21 = arith.constant 0 : index
    %45 = vector.load %arg8[%c0_20, %c0_21] : memref<128x1xf32, #tpu.memory_space<vmem>>, vector<128x1xf32>
    tpu.vector_store %arg8[%c0_20, %c0_21], %44 {strides = array<i32>} : memref<128x1xf32, #tpu.memory_space<vmem>>, vector<128x1xf32>,
    %c0_22 = arith.constant 0 : index
    %c0_23 = arith.constant 0 : index
    %46 = vector.load %arg7[%c0_22, %c0_23] : memref<128x1xf32, #tpu.memory_space<vmem>>, vector<128x1xf32>
    tpu.vector_store %arg7[%c0_22, %c0_23], %31 {strides = array<i32>} : memref<128x1xf32, #tpu.memory_space<vmem>>, vector<128x1xf32>,
    %c0_24 = arith.constant 0 : index
    %c0_25 = arith.constant 0 : index
    %47 = vector.load %arg9[%c0_24, %c0_25] : memref<128x1xf32, #tpu.memory_space<vmem>>, vector<128x1xf32>
    %cst_26 = arith.constant 0.000000e+00 : f32
    %48 = vector.broadcast %cst_26 : f32 to vector<128x128xf32>
    %49 = arith.select %25, %7, %48 : vector<128x128xi1>, vector<128x128xf32>
    %cst_27 = arith.constant dense<0.000000e+00> : vector<128xf32>
    %50 = vector.multi_reduction <add>, %49, %cst_27 [1] : vector<128x128xf32> to vector<128xf32>
    %51 = vector.shape_cast %50 : vector<128xf32> to vector<128x1xf32>
    %52 = arith.addf %47, %51 : vector<128x1xf32>
    %c0_28 = arith.constant 0 : index
    %c0_29 = arith.constant 0 : index
    %53 = vector.load %arg9[%c0_28, %c0_29] : memref<128x1xf32, #tpu.memory_space<vmem>>, vector<128x1xf32>
    tpu.vector_store %arg9[%c0_28, %c0_29], %52 {strides = array<i32>} : memref<128x1xf32, #tpu.memory_space<vmem>>, vector<128x1xf32>,
    %c0_30 = arith.constant 0 : index
    %c0_31 = arith.constant 0 : index
    %54 = vector.load %arg10[%c0_30, %c0_31] : memref<128x1xf32, #tpu.memory_space<vmem>>, vector<128x1xf32>
    %55 = arith.extui %25 : vector<128x128xi1> to vector<128x128xi32>
    %56 = arith.sitofp %55 : vector<128x128xi32> to vector<128x128xf32>
    %cst_32 = arith.constant dense<0.000000e+00> : vector<128xf32>
    %57 = vector.multi_reduction <add>, %56, %cst_32 [1] : vector<128x128xf32> to vector<128xf32>
    %58 = vector.shape_cast %57 : vector<128xf32> to vector<128x1xf32>
    %59 = arith.addf %54, %58 : vector<128x1xf32>
    %c0_33 = arith.constant 0 : index
    %c0_34 = arith.constant 0 : index
    %60 = vector.load %arg10[%c0_33, %c0_34] : memref<128x1xf32, #tpu.memory_space<vmem>>, vector<128x1xf32>
    tpu.vector_store %arg10[%c0_33, %c0_34], %59 {strides = array<i32>} : memref<128x1xf32, #tpu.memory_space<vmem>>, vector<128x1xf32>,
    %c0_i32_35 = arith.constant 0 : i32
    %61 = arith.cmpi eq, %arg1, %c0_i32_35 : i32
    %62 = arith.extui %61 : i1 to i32
    %c0_i32_36 = arith.constant 0 : i32
    %63 = arith.cmpi ne, %62, %c0_i32_36 : i32
    scf.if %63 {
      %c0_37 = arith.constant 0 : index
      %c0_38 = arith.constant 0 : index
      %64 = vector.load %arg10[%c0_37, %c0_38] : memref<128x1xf32, #tpu.memory_space<vmem>>, vector<128x1xf32>
      %c0_39 = arith.constant 0 : index
      %c0_40 = arith.constant 0 : index
      %65 = vector.load %arg9[%c0_39, %c0_40] : memref<128x1xf32, #tpu.memory_space<vmem>>, vector<128x1xf32>
      %c0_41 = arith.constant 0 : index
      %c0_42 = arith.constant 0 : index
      %66 = vector.load %arg7[%c0_41, %c0_42] : memref<128x1xf32, #tpu.memory_space<vmem>>, vector<128x1xf32>
      %67 = arith.mulf %66, %64 : vector<128x1xf32>
      %68 = arith.subf %65, %67 : vector<128x1xf32>
      %cst_43 = arith.constant 1.000000e+00 : f32
      %69 = vector.broadcast %cst_43 : f32 to vector<128x1xf32>
      %70 = arith.maximumf %64, %69 : vector<128x1xf32>
      %71 = arith.divf %68, %70 : vector<128x1xf32>
      %c0_44 = arith.constant 0 : index
      %c0_45 = arith.constant 0 : index
      %72 = vector.load %arg8[%c0_44, %c0_45] : memref<128x1xf32, #tpu.memory_space<vmem>>, vector<128x1xf32>
      %cst_46 = arith.constant 9.99999997E-7 : f32
      %73 = vector.broadcast %cst_46 : f32 to vector<128x1xf32>
      %74 = arith.addf %72, %73 : vector<128x1xf32>
      %75 = math.log %74 : vector<128x1xf32>
      %76 = arith.subf %71, %75 : vector<128x1xf32>
      %c128_i32_47 = arith.constant 128 : i32
      %77 = arith.muli %arg0, %c128_i32_47 : i32
      %78 = tpu.iota {dimensions = array<i32: 0>} : vector<128x1xi32>
      %79 = vector.broadcast %77 : i32 to vector<128x1xi32>
      %80 = arith.addi %79, %78 : vector<128x1xi32>
      %c8_i32_48 = arith.constant 8 : i32
      %81 = vector.broadcast %c8_i32_48 : i32 to vector<128x1xi32>
      %82 = arith.cmpi slt, %80, %81 : vector<128x1xi32>
      %cst_49 = arith.constant -1.000000e+00 : f32
      %83 = vector.broadcast %cst_49 : f32 to vector<128x1xf32>
      %84 = arith.mulf %83, %76 : vector<128x1xf32>
      %cst_50 = arith.constant 0.000000e+00 : f32
      %85 = vector.broadcast %cst_50 : f32 to vector<128x1xf32>
      %86 = arith.select %82, %84, %85 : vector<128x1xi1>, vector<128x1xf32>
      %c0_51 = arith.constant 0 : index
      %c0_52 = arith.constant 0 : index
      %87 = vector.load %arg6[%c0_51, %c0_52] : memref<128x1xf32, #tpu.memory_space<vmem>>, vector<128x1xf32>
      tpu.vector_store %arg6[%c0_51, %c0_52], %86 {strides = array<i32>} : memref<128x1xf32, #tpu.memory_space<vmem>>, vector<128x1xf32>,
    } else {
    }
    return
  }
  func.func @transform_0(%arg0: i32, %arg1: i32) -> (i32, i32) {
    %c0_i32 = arith.constant 0 : i32
    %c0_i32_0 = arith.constant 0 : i32
    return %arg0, %c0_i32 : i32, i32
  }
  func.func @transform_1(%arg0: i32, %arg1: i32) -> (i32, i32) {
    %c0_i32 = arith.constant 0 : i32
    %c0_i32_0 = arith.constant 0 : i32
    return %c0_i32, %arg1 : i32, i32
  }
  func.func @transform_2(%arg0: i32, %arg1: i32) -> (i32, i32) {
    %c0_i32 = arith.constant 0 : i32
    %c0_i32_0 = arith.constant 0 : i32
    return %arg0, %c0_i32 : i32, i32
  }
  func.func @transform_3(%arg0: i32, %arg1: i32) -> (i32, i32) {
    %c0_i32 = arith.constant 0 : i32
    %c0_i32_0 = arith.constant 0 : i32
    return %arg1, %c0_i32 : i32, i32
  }
  func.func @transform_4(%arg0: i32, %arg1: i32) -> (i32, i32) {
    %c0_i32 = arith.constant 0 : i32
    %c0_i32_0 = arith.constant 0 : i32
    return %arg0, %c0_i32 : i32, i32
  }
}

</mosaic_0001>

<bundles_post_ra>
// kernel: tpu_custom_call.1
= control target key start
LH: loop header
LB: loop body
LE: loop exit
PB: predicated region body
PF: predicated region fallthrough
CT: control target
= control target key end

     0   :  { %9 = vsyncpa [#allocation7], 0  ;;  %s1575_s15 = smov [#allocation6]   ;;  %s2683_s0 = inlined_call_operand.vmem [shape: s32[128,1], index: 0, kind: input, shape index: {}]   ;;  %s2684_s1 = inlined_call_operand.vmem [shape: s32[1,128], index: 1, kind: input, shape index: {}]   ;;  %s2685_s2 = inlined_call_operand.vmem [shape: f32[128,128], index: 2, kind: input, shape index: {}]   ;;  %s2686_s3 = inlined_call_operand.hbm [shape: f32[128,128], index: 3, kind: input, shape index: {}]   ;;  %s2687_s4 = inlined_call_operand.vmem [shape: f32[128,1], index: 4, kind: output, shape index: {}]  }
   0x1   :  { %s21_s16 = sshll.u32 %s1575_s15, 4  ;;  %s22_s16 = int_to_ptr.vmem [resolvable:$true] %s21_s16 }
   0x2   :  { %s1561_s17 = scalar_lea.vmem %s22_s16, 2048  ;;  %p1566_p1 = scmp.lt.s32.totalorder %s22_s16, %s22_s16 }
   0x3   :  { %p1562_p0 = scmp.ne.s32.totalorder %s22_s16, %s1561_s17  ;;  %p1567_p2 = scmp.lt.s32.totalorder %s1561_s17, %s1561_s17 }
   0x5   :  { %p1568_p3 = por %p1567_p2, %p1566_p1 }
   0x7   :  { %p1569_p4 = pnand %p1568_p3, %p1562_p0 }
   0x9   :  { %1572 = shalt.err (!%p1569_p4)
}
   0xa   :  { %s1576_s18 = smov 128   ;;  %s1577_s19 = smov 8  }
   0xb   :  { %27 = dma.hbm_to_vmem [thread:$0]  %s2686_s3, 2048, %s22_s16, [#allocation7], %s1576_s18, %s1576_s18, %s1577_s19  }
   0xc   :  { %1573 = dma.done.wait [#allocation7], 2048  }
   0xd   :  { %1574 = vsyncadd [#allocation7], 4294965248  ;;  %vm2688_vm0 = vcmask 7168   ;;  %v2694_v0 = vmov 0.0   ;;  %v1579_v1 = vmov 0   ;;  %v147_v2 = vld [vmem:[#allocation6 + $0x78] sm:$0xff] }
   0xe   :  { %1320 = vst.msk [vmem:[%s2687_s4 + $0x8] sm:$0xff] %vm2688_vm0, %v2694_v0  ;;  %1321 = vst.msk [vmem:[%s2687_s4 + $0x10] sm:$0xff] %vm2688_vm0, %v2694_v0  ;;  %1483 = vset.pattern.permute.xlu0 %v1579_v1  ;;  %1484 = vset.pattern.permute.xlu1 %v1579_v1  ;;  %v146_v3 = vld [vmem:[#allocation6 + $0x70] sm:$0xff]  ;;  %v145_v4 = vld [vmem:[#allocation6 + $0x68] sm:$0xff] }
   0xf   :  { %1322 = vst.msk [vmem:[%s2687_s4 + $0x18] sm:$0xff] %vm2688_vm0, %v2694_v0  ;;  %1323 = vst.msk [vmem:[%s2687_s4 + $0x20] sm:$0xff] %vm2688_vm0, %v2694_v0  ;;  %1389 = vmatprep.subr.mxu0 %v147_v2  ;;  %1445 = vmatprep.subr.mxu1 %v147_v2  ;;  %v100_v5 = vld [vmem:[%s2685_s2] sm:$0xff]  ;;  %v143_v10 = vld [vmem:[#allocation6 + $0x58] sm:$0xff] }
  0x10   :  { %1324 = vst.msk [vmem:[%s2687_s4 + $0x28] sm:$0xff] %vm2688_vm0, %v2694_v0  ;;  %1325 = vst.msk [vmem:[%s2687_s4 + $0x30] sm:$0xff] %vm2688_vm0, %v2694_v0  ;;  %1390 = vmatpush3.xpose.msra.mxu0 %v147_v2  ;;  %1461 = vmatpush3.xpose.msra.mxu1 %v147_v2  ;;  %v108_v6 = vld [vmem:[%s2685_s2 + $0x40] sm:$0xff]  ;;  %v116_v7 = vmul.f32 14.285714, %v100_v5  ;;  %v368_v12 = vld [vmem:[%s2683_s0 + $0x10] sm:$0xff] }
  0x11   :  { %1326 = vst.msk [vmem:[%s2687_s4 + $0x38] sm:$0xff] %vm2688_vm0, %v2694_v0  ;;  %1327 = vst.msk [vmem:[%s2687_s4 + $0x40] sm:$0xff] %vm2688_vm0, %v2694_v0  ;;  %1391 = vmatprep.subr.mxu0 %v146_v3  ;;  %1446 = vmatprep.subr.mxu1 %v146_v3  ;;  %v124_v8 = vmul.f32 14.285714, %v108_v6  ;;  %v144_v9 = vld [vmem:[#allocation6 + $0x60] sm:$0xff]  ;;  %v142_v13 = vld [vmem:[#allocation6 + $0x50] sm:$0xff] }
  0x12   :  { %1328 = vst.msk [vmem:[%s2687_s4 + $0x48] sm:$0xff] %vm2688_vm0, %v2694_v0  ;;  %1329 = vst.msk [vmem:[%s2687_s4 + $0x50] sm:$0xff] %vm2688_vm0, %v2694_v0  ;;  %1421 = vmatprep.mubr.f32.mxu0 %v116_v7  ;;  %v366_v11 = vld [vmem:[%s2683_s0] sm:$0xff]  ;;  %390 = vperm.xlu1 %1484, %v368_v12   ;;  %v367_v14 = vld [vmem:[%s2683_s0 + $0x8] sm:$0xff]  ;;  %v2727_v7 = vmov 0 }
  0x13   :  { %1330 = vst.msk [vmem:[%s2687_s4 + $0x58] sm:$0xff] %vm2688_vm0, %v2694_v0  ;;  %1331 = vst.msk [vmem:[%s2687_s4 + $0x60] sm:$0xff] %vm2688_vm0, %v2694_v0  ;;  %1433 = vmatprep.mubr.f32.mxu1 %v124_v8  ;;  %384 = vperm.xlu0 %1483, %v366_v11   ;;  %v369_v15 = vld [vmem:[%s2683_s0 + $0x18] sm:$0xff]  ;;  %v141_v16 = vld [vmem:[#allocation6 + $0x48] sm:$0xff] }
  0x14   :  { %1332 = vst.msk [vmem:[%s2687_s4 + $0x68] sm:$0xff] %vm2688_vm0, %v2694_v0  ;;  %1333 = vst.msk [vmem:[%s2687_s4 + $0x70] sm:$0xff] %vm2688_vm0, %v2694_v0  ;;  %1392 = vmatpush3.xpose.msra.mxu0 %v146_v3  ;;  %1462 = vmatpush3.xpose.msra.mxu1 %v146_v3  ;;  %v370_v17 = vld [vmem:[%s2683_s0 + $0x20] sm:$0xff]  ;;  %v371_v18 = vld [vmem:[%s2683_s0 + $0x28] sm:$0xff]  ;;  %v294_v3 = vlaneseq }
  0x15   :  { %1334 = vst.msk [vmem:[%s2687_s4 + $0x78] sm:$0xff] %vm2688_vm0, %v2694_v0  ;;  %52 = vst.msk [vmem:[#allocation3] sm:$0xff] %vm2688_vm0, %v2694_v0  ;;  %1393 = vmatprep.subr.mxu0 %v145_v4  ;;  %1447 = vmatprep.subr.mxu1 %v145_v4  ;;  %v140_v19 = vld [vmem:[#allocation6 + $0x40] sm:$0xff]  ;;  %v372_v20 = vld [vmem:[%s2683_s0 + $0x30] sm:$0xff] }
  0x16   :  { %53 = vst.msk [vmem:[#allocation3 + $0x8] sm:$0xff] %vm2688_vm0, %v2694_v0  ;;  %54 = vst.msk [vmem:[#allocation3 + $0x10] sm:$0xff] %vm2688_vm0, %v2694_v0  ;;  %393 = vperm.xlu1 %1484, %v369_v15   ;;  %v373_v21 = vld [vmem:[%s2683_s0 + $0x38] sm:$0xff]  ;;  %v374_v23 = vld [vmem:[%s2683_s0 + $0x40] sm:$0xff]  ;;  %v1878_v5 = vand.u32 127, %v294_v3 }
  0x17   :  { %55 = vst.msk [vmem:[#allocation3 + $0x18] sm:$0xff] %vm2688_vm0, %v2694_v0  ;;  %56 = vst.msk [vmem:[#allocation3 + $0x20] sm:$0xff] %vm2688_vm0, %v2694_v0  ;;  %387 = vperm.xlu0 %1483, %v367_v14   ;;  %v139_v22 = vld [vmem:[#allocation6 + $0x38] sm:$0xff]  ;;  %v375_v24 = vld [vmem:[%s2683_s0 + $0x48] sm:$0xff] }
  0x18   :  { %57 = vst.msk [vmem:[#allocation3 + $0x28] sm:$0xff] %vm2688_vm0, %v2694_v0  ;;  %58 = vst.msk [vmem:[#allocation3 + $0x30] sm:$0xff] %vm2688_vm0, %v2694_v0  ;;  %1394 = vmatpush3.xpose.msra.mxu0 %v145_v4  ;;  %1463 = vmatpush3.xpose.msra.mxu1 %v145_v4  ;;  %v138_v25 = vld [vmem:[#allocation6 + $0x30] sm:$0xff]  ;;  %v377_v27 = vld [vmem:[%s2683_s0 + $0x58] sm:$0xff]  ;;  %v1876_v4 = vshrl.u32 %v294_v3, 7  ;;  %vm2693_vm1 = vcmp.lt.s32.totalorder %v1878_v5, 8 }
  0x19   :  { %59 = vst.msk [vmem:[#allocation3 + $0x38] sm:$0xff] %vm2688_vm0, %v2694_v0  ;;  %60 = vst.msk [vmem:[#allocation3 + $0x40] sm:$0xff] %vm2688_vm0, %v2694_v0  ;;  %1395 = vmatprep.subr.mxu0 %v144_v9  ;;  %1448 = vmatprep.subr.mxu1 %v144_v9  ;;  %v376_v26 = vld [vmem:[%s2683_s0 + $0x50] sm:$0xff]  ;;  %v137_v28 = vld [vmem:[#allocation6 + $0x28] sm:$0xff] }
  0x1a   :  { %61 = vst.msk [vmem:[#allocation3 + $0x48] sm:$0xff] %vm2688_vm0, %v2694_v0  ;;  %62 = vst.msk [vmem:[#allocation3 + $0x50] sm:$0xff] %vm2688_vm0, %v2694_v0  ;;  %399 = vperm.xlu1 %1484, %v371_v18   ;;  %v380_v29 = vld [vmem:[%s2683_s0 + $0x70] sm:$0xff]  ;;  %v378_v30 = vld [vmem:[%s2683_s0 + $0x60] sm:$0xff]  ;;  %vm334_vm2 = vcmp.ne.s32.totalorder %v1876_v4, %v1878_v5 }
  0x1b   :  { %63 = vst.msk [vmem:[#allocation3 + $0x58] sm:$0xff] %vm2688_vm0, %v2694_v0  ;;  %64 = vst.msk [vmem:[#allocation3 + $0x60] sm:$0xff] %vm2688_vm0, %v2694_v0  ;;  %396 = vperm.xlu0 %1483, %v370_v17   ;;  %v136_v31 = vld [vmem:[#allocation6 + $0x20] sm:$0xff]  ;;  %v379_v32 = vld [vmem:[%s2683_s0 + $0x68] sm:$0xff] }
  0x1c   :  { %65 = vst.msk [vmem:[#allocation3 + $0x68] sm:$0xff] %vm2688_vm0, %v2694_v0  ;;  %66 = vst.msk [vmem:[#allocation3 + $0x70] sm:$0xff] %vm2688_vm0, %v2694_v0  ;;  %1396 = vmatpush3.xpose.msra.mxu0 %v144_v9  ;;  %1464 = vmatpush3.xpose.msra.mxu1 %v144_v9  ;;  %v135_v33 = vld [vmem:[#allocation6 + $0x18] sm:$0xff]  ;;  %v134_v35 = vld [vmem:[#allocation6 + $0x10] sm:$0xff] }
  0x1d   :  { %67 = vst.msk [vmem:[#allocation3 + $0x78] sm:$0xff] %vm2688_vm0, %v2694_v0  ;;  %68 = vst.msk [vmem:[#allocation4] sm:$0xff] %vm2688_vm0, %v2694_v0  ;;  %1397 = vmatprep.subr.mxu0 %v143_v10  ;;  %1449 = vmatprep.subr.mxu1 %v143_v10  ;;  %v381_v34 = vld [vmem:[%s2683_s0 + $0x78] sm:$0xff]  ;;  %v133_v36 = vld [vmem:[#allocation6 + $0x8] sm:$0xff] }
  0x1e   :  { %69 = vst.msk [vmem:[#allocation4 + $0x8] sm:$0xff] %vm2688_vm0, %v2694_v0  ;;  %70 = vst.msk [vmem:[#allocation4 + $0x10] sm:$0xff] %vm2688_vm0, %v2694_v0  ;;  %405 = vperm.xlu1 %1484, %v373_v21   ;;  %v132_v37 = vld [vmem:[#allocation6] sm:$0xff]  ;;  %v101_v38 = vld [vmem:[%s2685_s2 + $0x8] sm:$0xff] }
  0x1f   :  { %71 = vst.msk [vmem:[#allocation4 + $0x18] sm:$0xff] %vm2688_vm0, %v2694_v0  ;;  %72 = vst.msk [vmem:[#allocation4 + $0x20] sm:$0xff] %vm2688_vm0, %v2694_v0  ;;  %402 = vperm.xlu0 %1483, %v372_v20   ;;  %v109_v39 = vld [vmem:[%s2685_s2 + $0x48] sm:$0xff]  ;;  %v102_v40 = vld [vmem:[%s2685_s2 + $0x10] sm:$0xff]  ;;  %v117_v42 = vmul.f32 14.285714, %v101_v38 }
  0x20   :  { %73 = vst.msk [vmem:[#allocation4 + $0x28] sm:$0xff] %vm2688_vm0, %v2694_v0  ;;  %74 = vst.msk [vmem:[#allocation4 + $0x30] sm:$0xff] %vm2688_vm0, %v2694_v0  ;;  %1398 = vmatpush3.xpose.msra.mxu0 %v143_v10  ;;  %1465 = vmatpush3.xpose.msra.mxu1 %v143_v10  ;;  %v110_v41 = vld [vmem:[%s2685_s2 + $0x50] sm:$0xff]  ;;  %v125_v43 = vmul.f32 14.285714, %v109_v39  ;;  %v103_v46 = vld [vmem:[%s2685_s2 + $0x18] sm:$0xff] }
  0x21   :  { %75 = vst.msk [vmem:[#allocation4 + $0x38] sm:$0xff] %vm2688_vm0, %v2694_v0  ;;  %76 = vst.msk [vmem:[#allocation4 + $0x40] sm:$0xff] %vm2688_vm0, %v2694_v0  ;;  %1399 = vmatprep.subr.mxu0 %v142_v13  ;;  %1450 = vmatprep.subr.mxu1 %v142_v13  ;;  %v118_v44 = vmul.f32 14.285714, %v102_v40  ;;  %v126_v45 = vmul.f32 14.285714, %v110_v41 }
  0x22   :  { %77 = vst.msk [vmem:[#allocation4 + $0x48] sm:$0xff] %vm2688_vm0, %v2694_v0  ;;  %78 = vst.msk [vmem:[#allocation4 + $0x50] sm:$0xff] %vm2688_vm0, %v2694_v0  ;;  %411 = vperm.xlu1 %1484, %v375_v24   ;;  %v111_v47 = vld [vmem:[%s2685_s2 + $0x58] sm:$0xff]  ;;  %v104_v48 = vld [vmem:[%s2685_s2 + $0x20] sm:$0xff]  ;;  %v119_v50 = vmul.f32 14.285714, %v103_v46 }
  0x23   :  { %79 = vst.msk [vmem:[#allocation4 + $0x58] sm:$0xff] %vm2688_vm0, %v2694_v0  ;;  %80 = vst.msk [vmem:[#allocation4 + $0x60] sm:$0xff] %vm2688_vm0, %v2694_v0  ;;  %408 = vperm.xlu0 %1483, %v374_v23   ;;  %v112_v49 = vld [vmem:[%s2685_s2 + $0x60] sm:$0xff]  ;;  %v127_v51 = vmul.f32 14.285714, %v111_v47  ;;  %v105_v54 = vld [vmem:[%s2685_s2 + $0x28] sm:$0xff] }
  0x24   :  { %81 = vst.msk [vmem:[#allocation4 + $0x68] sm:$0xff] %vm2688_vm0, %v2694_v0  ;;  %82 = vst.msk [vmem:[#allocation4 + $0x70] sm:$0xff] %vm2688_vm0, %v2694_v0  ;;  %1400 = vmatpush3.xpose.msra.mxu0 %v142_v13  ;;  %1466 = vmatpush3.xpose.msra.mxu1 %v142_v13  ;;  %v120_v52 = vmul.f32 14.285714, %v104_v48  ;;  %v128_v53 = vmul.f32 14.285714, %v112_v49 }
  0x25   :  { %83 = vst.msk [vmem:[#allocation4 + $0x78] sm:$0xff] %vm2688_vm0, %v2694_v0  ;;  %84 = vst.msk [vmem:[#allocation5] sm:$0xff] %vm2688_vm0, %v2694_v0  ;;  %1401 = vmatprep.subr.mxu0 %v141_v16  ;;  %1451 = vmatprep.subr.mxu1 %v141_v16  ;;  %v113_v55 = vld [vmem:[%s2685_s2 + $0x68] sm:$0xff]  ;;  %v106_v56 = vld [vmem:[%s2685_s2 + $0x30] sm:$0xff]  ;;  %v121_v58 = vmul.f32 14.285714, %v105_v54 }
  0x26   :  { %85 = vst.msk [vmem:[#allocation5 + $0x8] sm:$0xff] %vm2688_vm0, %v2694_v0  ;;  %86 = vst.msk [vmem:[#allocation5 + $0x10] sm:$0xff] %vm2688_vm0, %v2694_v0  ;;  %417 = vperm.xlu1 %1484, %v377_v27   ;;  %v114_v57 = vld [vmem:[%s2685_s2 + $0x70] sm:$0xff]  ;;  %v129_v59 = vmul.f32 14.285714, %v113_v55  ;;  %v107_v62 = vld [vmem:[%s2685_s2 + $0x38] sm:$0xff] }
  0x27   :  { %87 = vst.msk [vmem:[#allocation5 + $0x18] sm:$0xff] %vm2688_vm0, %v2694_v0  ;;  %88 = vst.msk [vmem:[#allocation5 + $0x20] sm:$0xff] %vm2688_vm0, %v2694_v0  ;;  %414 = vperm.xlu0 %1483, %v376_v26   ;;  %v122_v60 = vmul.f32 14.285714, %v106_v56  ;;  %v130_v61 = vmul.f32 14.285714, %v114_v57 }
  0x28   :  { %89 = vst.msk [vmem:[#allocation5 + $0x28] sm:$0xff] %vm2688_vm0, %v2694_v0  ;;  %90 = vst.msk [vmem:[#allocation5 + $0x30] sm:$0xff] %vm2688_vm0, %v2694_v0  ;;  %1402 = vmatpush3.xpose.msra.mxu0 %v141_v16  ;;  %1467 = vmatpush3.xpose.msra.mxu1 %v141_v16  ;;  %v115_v63 = vld [vmem:[%s2685_s2 + $0x78] sm:$0xff]  ;;  %v123_v1 = vmul.f32 14.285714, %v107_v62  ;;  %v1580_v24 = vmov -inf  }
  0x29   :  { %91 = vst.msk [vmem:[#allocation5 + $0x38] sm:$0xff] %vm2688_vm0, %v2694_v0  ;;  %92 = vst.msk [vmem:[#allocation5 + $0x40] sm:$0xff] %vm2688_vm0, %v2694_v0  ;;  %1403 = vmatprep.subr.mxu0 %v140_v19  ;;  %1452 = vmatprep.subr.mxu1 %v140_v19  ;;  %v131_v2 = vmul.f32 14.285714, %v115_v63  ;;  %v1886_v6 = vld [vmem:[%s2684_s1] ss:$0 sm:$0xff] }
  0x2a   :  { %93 = vst.msk [vmem:[#allocation5 + $0x48] sm:$0xff] %vm2688_vm0, %v2694_v0  ;;  %94 = vst.msk [vmem:[#allocation5 + $0x50] sm:$0xff] %vm2688_vm0, %v2694_v0  ;;  %420 = vperm.xlu1 %1484, %v378_v30   ;;  %v297_v46 = vadd.s32 16, %v1876_v4 }
  0x2b   :  { %95 = vst.msk [vmem:[#allocation5 + $0x58] sm:$0xff] %vm2688_vm0, %v2694_v0  ;;  %96 = vst.msk [vmem:[#allocation5 + $0x60] sm:$0xff] %vm2688_vm0, %v2694_v0  ;;  %426 = vperm.xlu0 %1483, %v380_v29  }
  0x2c   :  { %97 = vst.msk [vmem:[#allocation5 + $0x68] sm:$0xff] %vm2688_vm0, %v2694_v0  ;;  %98 = vst.msk [vmem:[#allocation5 + $0x70] sm:$0xff] %vm2688_vm0, %v2694_v0  ;;  %1404 = vmatpush3.xpose.msra.mxu0 %v140_v19  ;;  %1468 = vmatpush3.xpose.msra.mxu1 %v140_v19  ;;  %v948_v54 = vld [vmem:[#allocation5] sm:$0xff] }
  0x2d   :  { %99 = vst.msk [vmem:[#allocation5 + $0x78] sm:$0xff] %vm2688_vm0, %v2694_v0  ;;  %1405 = vmatprep.subr.mxu0 %v139_v22  ;;  %1453 = vmatprep.subr.mxu1 %v139_v22  ;;  %vm1890_vm3 = vmand %vm2693_vm1, %vm334_vm2 }
  0x2e   :  { %423 = vperm.xlu1 %1484, %v379_v32   ;;  %v2728_v7 = vsel %vm1890_vm3, 4294967295, %v2727_v7  ;;  %37 = vst.msk [vmem:[#allocation2 + $0x8] sm:$0xff] %vm2688_vm0, %v1580_v24  ;;  %36 = vst.msk [vmem:[#allocation2] sm:$0xff] %vm2688_vm0, %v1580_v24  ;;  %v2731_v32 = vmov 0 }
  0x2f   :  { %38 = vst.msk [vmem:[#allocation2 + $0x10] sm:$0xff] %vm2688_vm0, %v1580_v24  ;;  %39 = vst.msk [vmem:[#allocation2 + $0x18] sm:$0xff] %vm2688_vm0, %v1580_v24 }
  0x30   :  { %1406 = vmatpush3.xpose.msra.mxu0 %v139_v22  ;;  %1469 = vmatpush3.xpose.msra.mxu1 %v139_v22  ;;  %40 = vst.msk [vmem:[#allocation2 + $0x20] sm:$0xff] %vm2688_vm0, %v1580_v24  ;;  %41 = vst.msk [vmem:[#allocation2 + $0x28] sm:$0xff] %vm2688_vm0, %v1580_v24 }
  0x31   :  { %1407 = vmatprep.subr.mxu0 %v138_v25  ;;  %1454 = vmatprep.subr.mxu1 %v138_v25  ;;  %42 = vst.msk [vmem:[#allocation2 + $0x30] sm:$0xff] %vm2688_vm0, %v1580_v24  ;;  %43 = vst.msk [vmem:[#allocation2 + $0x38] sm:$0xff] %vm2688_vm0, %v1580_v24 }
  0x32   :  { %429 = vperm.xlu1 %1484, %v381_v34   ;;  %44 = vst.msk [vmem:[#allocation2 + $0x40] sm:$0xff] %vm2688_vm0, %v1580_v24  ;;  %45 = vst.msk [vmem:[#allocation2 + $0x48] sm:$0xff] %vm2688_vm0, %v1580_v24 }
  0x33   :  { %46 = vst.msk [vmem:[#allocation2 + $0x50] sm:$0xff] %vm2688_vm0, %v1580_v24  ;;  %47 = vst.msk [vmem:[#allocation2 + $0x58] sm:$0xff] %vm2688_vm0, %v1580_v24 }
  0x34   :  { %1408 = vmatpush3.xpose.msra.mxu0 %v138_v25  ;;  %1470 = vmatpush3.xpose.msra.mxu1 %v138_v25  ;;  %48 = vst.msk [vmem:[#allocation2 + $0x60] sm:$0xff] %vm2688_vm0, %v1580_v24  ;;  %49 = vst.msk [vmem:[#allocation2 + $0x68] sm:$0xff] %vm2688_vm0, %v1580_v24  ;;  %v296_v25 = vadd.s32 8, %v1876_v4 }
  0x35   :  { %1409 = vmatprep.subr.mxu0 %v137_v28  ;;  %1455 = vmatprep.subr.mxu1 %v137_v28  ;;  %50 = vst.msk [vmem:[#allocation2 + $0x70] sm:$0xff] %vm2688_vm0, %v1580_v24  ;;  %51 = vst.msk [vmem:[#allocation2 + $0x78] sm:$0xff] %vm2688_vm0, %v1580_v24  ;;  %v2743_v24 = vmov 0 }
  0x36   :  { %vm335_vm11 = vcmp.ne.s32.totalorder %v296_v25, %v1878_v5 }
  0x37   :  { %vm1974_vm13 = vmand %vm2693_vm1, %vm335_vm11  ;;  %vm336_vm11 = vcmp.ne.s32.totalorder %v297_v46, %v1878_v5 }
  0x38   :  { %1410 = vmatpush3.xpose.msra.mxu0 %v137_v28  ;;  %1471 = vmatpush3.xpose.msra.mxu1 %v137_v28  ;;  %v2732_v32 = vsel %vm1974_vm13, 4294967295, %v2731_v32 }
  0x39   :  { %1411 = vmatprep.subr.mxu0 %v136_v31  ;;  %1456 = vmatprep.subr.mxu1 %v136_v31 }
  0x3c   :  { %1412 = vmatpush3.xpose.msra.mxu0 %v136_v31  ;;  %1472 = vmatpush3.xpose.msra.mxu1 %v136_v31 }
  0x3d   :  { %1413 = vmatprep.subr.mxu0 %v135_v33  ;;  %1457 = vmatprep.subr.mxu1 %v135_v33 }
  0x40   :  { %1414 = vmatpush3.xpose.msra.mxu0 %v135_v33  ;;  %1473 = vmatpush3.xpose.msra.mxu1 %v135_v33  ;;  %v298_v33 = vadd.s32 24, %v1876_v4 }
  0x41   :  { %1415 = vmatprep.subr.mxu0 %v134_v35  ;;  %1458 = vmatprep.subr.mxu1 %v134_v35 }
  0x42   :  { %vm337_vm15 = vcmp.ne.s32.totalorder %v298_v33, %v1878_v5 }
  0x44   :  { %1416 = vmatpush3.xpose.msra.mxu0 %v134_v35  ;;  %1474 = vmatpush3.xpose.msra.mxu1 %v134_v35  ;;  %v308_v35 = vadd.s32 104, %v1876_v4 }
  0x45   :  { %1417 = vmatprep.subr.mxu0 %v133_v36  ;;  %1459 = vmatprep.subr.mxu1 %v133_v36 }
  0x48   :  { %1418 = vmatpush3.xpose.msra.mxu0 %v133_v36  ;;  %1475 = vmatpush3.xpose.msra.mxu1 %v133_v36 }
  0x49   :  { %1419 = vmatprep.subr.mxu0 %v132_v37  ;;  %1460 = vmatprep.subr.mxu1 %v132_v37 }
  0x4c   :  { %1420 = vmatpush3.xpose.msra.mxu0 %v132_v37  ;;  %1476 = vmatpush3.xpose.msra.mxu1 %v132_v37 }
  0x4f   :  { %1422 = vmatmul.mubr.f32.vlgmr.msra.gmra.mxu0 %v117_v42  ;;  %1434 = vmatmul.mubr.f32.vlgmr.msra.gmra.mxu1 %v125_v43  ;;  %v2735_v42 = vmov 0 }
  0x50   :  { %1424 = vmatprep.mubr.f32.mxu0 %v118_v44  ;;  %1436 = vmatprep.mubr.f32.mxu1 %v126_v45 }
  0x53   :  { %1425 = vmatmul.mubr.f32.gmra.mxu0 %v119_v50  ;;  %1437 = vmatmul.mubr.f32.gmra.mxu1 %v127_v51 }
  0x54   :  { %1427 = vmatprep.mubr.f32.mxu0 %v120_v52  ;;  %1439 = vmatprep.mubr.f32.mxu1 %v128_v53  ;;  %v2739_v53 = vmov 0 }
  0x57   :  { %1428 = vmatmul.mubr.f32.gmra.mxu0 %v121_v58  ;;  %1440 = vmatmul.mubr.f32.gmra.mxu1 %v129_v59 }
  0x58   :  { %1430 = vmatprep.mubr.f32.mxu0 %v122_v60  ;;  %1442 = vmatprep.mubr.f32.mxu1 %v130_v61  ;;  %v300_v61 = vadd.s32 40, %v1876_v4 }
  0x5b   :  { %1431 = vmatmul.mubr.f32.gmra.mxu0 %v123_v1  ;;  %1443 = vmatmul.mubr.f32.gmra.mxu1 %v131_v2  ;;  %v299_v2 = vadd.s32 32, %v1876_v4 }
  0x8d   :  { %v1894_v9 = vpop.permute.xlu1 %390 }
  0x8e   :  { %v385_v8 = vpop.permute.xlu0 %384 }
  0x8f   :  { %vm435_vm4 = vcmp.eq.s32.totalorder %v385_v8, %v1886_v6 }
  0x90   :  { %vm1899_vm5 = vmand %vm435_vm4, %vm1890_vm3 }
  0x91   :  { %v1341_v11 = vsel %vm1899_vm5, 1.0, %v2694_v0  ;;  %v1906_v13 = vpop.permute.xlu1 %393  ;;  %vm2008_vm4 = vmand %vm2693_vm1, %vm337_vm15 }
  0x92   :  { %v388_v12 = vpop.permute.xlu0 %387  ;;  %996 = vadd.xlane.f32.xlu1 %v1341_v11  ;;  %vm438_vm2 = vcmp.eq.s32.totalorder %v1906_v13, %v1886_v6  ;;  %v2736_v42 = vsel %vm2008_vm4, 4294967295, %v2735_v42  ;;  %vm2044_vm15 = vmand %vm2693_vm1, %vm336_vm11  ;;  %vm339_vm11 = vcmp.ne.s32.totalorder %v300_v61, %v1878_v5  ;;  %v303_v11 = vadd.s32 64, %v1876_v4  ;;  %v2195_v61 = vld [vmem:[#allocation2] sm:$0xff] }
  0x93   :  { %vm436_vm12 = vcmp.eq.s32.totalorder %v388_v12, %v1886_v6  ;;  %v2740_v53 = vsel %vm2044_vm15, 4294967295, %v2739_v53  ;;  %vm2093_vm8 = vmand %vm2693_vm1, %vm339_vm11  ;;  %2763 = vst [vmem:[#allocation9_spill] sm:$0xff] %v2195_v61 }
  0x94   :  { %vm1983_vm14 = vmand %vm436_vm12, %vm1974_vm13  ;;  %vm437_vm12 = vcmp.eq.s32.totalorder %v1894_v9, %v1886_v6  ;;  %v302_v9 = vadd.s32 56, %v1876_v4  ;;  %v2744_v24 = vsel %vm2093_vm8, 4294967295, %v2743_v24  ;;  %vm342_vm11 = vcmp.ne.s32.totalorder %v303_v11, %v1878_v5 }
  0x95   :  { %v1910_v15 = vpop.permute.xlu1 %399 }
  0x96   :  { %v1908_v14 = vpop.permute.xlu0 %396  ;;  %vm440_vm10 = vcmp.eq.s32.totalorder %v1910_v15, %v1886_v6  ;;  %vm341_vm6 = vcmp.ne.s32.totalorder %v302_v9, %v1878_v5  ;;  %v2745_v15 = vmov 0 }
  0x97   :  { %vm439_vm9 = vcmp.eq.s32.totalorder %v1908_v14, %v1886_v6 }
  0x99   :  { %v1914_v17 = vpop.permute.xlu1 %405 }
  0x9a   :  { %v1912_v16 = vpop.permute.xlu0 %402 }
  0x9d   :  { %v1918_v19 = vpop.permute.xlu1 %411 }
  0x9e   :  { %v1916_v18 = vpop.permute.xlu0 %408 }
  0xa1   :  { %v1924_v21 = vpop.permute.xlu1 %417 }
  0xa2   :  { %v1922_v20 = vpop.permute.xlu0 %414 }
  0xa3   :  { %vm2804_vm3 = vcmp.eq.s32.totalorder %v1922_v20, %v1886_v6 }
  0xa5   :  { %v1930_v22 = vpop.permute.xlu1 %420 }
  0xa9   :  { %v1934_v23 = vpop.permute.xlu1 %423 }
  0xad   :  { %v2038_v52 = vpop.permute.xlu1 %429 }
 0x10f   :  { %v1955_v26 = vpop.f32.mrf.mxu0  ;;  %v1961_v28 = vpop.f32.mrf.mxu1 }
 0x110   :  { %v468_v27 = vsel %vm2693_vm1, %v1955_v26, -inf  ;;  %v476_v31 = vsel %vm2693_vm1, %v1961_v28, -inf  ;;  %v869_v37 = vsel %vm1983_vm14, %v1955_v26, 0.0 }
 0x111   :  { %501 = vmax.xlane.f32.xlu1 %v468_v27  ;;  %v1963_v29 = vpop.f32.mrf.mxu0  ;;  %v1979_v34 = vpop.f32.mrf.mxu1  ;;  %v2749_v27 = vmov 0 }
 0x112   :  { %v467_v30 = vsel %vm2693_vm1, %v1963_v29, -inf  ;;  %v475_v36 = vsel %vm2693_vm1, %v1979_v34, -inf  ;;  %v868_v40 = vsel %vm1899_vm5, %v1963_v29, 0.0  ;;  %vm2019_vm5 = vmand %vm438_vm2, %vm2008_vm4 }
 0x113   :  { %499 = vmax.xlane.f32.xlu0 %v467_v30  ;;  %v1994_v38 = vpop.f32.mrf.mxu1  ;;  %v1996_v39 = vpop.f32.mrf.mxu0  ;;  %vm2060_vm2 = vmand %vm437_vm12, %vm2044_vm15  ;;  %vm338_vm12 = vcmp.ne.s32.totalorder %v299_v2, %v1878_v5  ;;  %vm442_vm15 = vcmp.eq.s32.totalorder %v1914_v17, %v1886_v6 }
 0x114   :  { %v478_v41 = vsel %vm2693_vm1, %v1994_v38, -inf  ;;  %v470_v43 = vsel %vm2693_vm1, %v1996_v39, -inf  ;;  %v871_v47 = vsel %vm2019_vm5, %v1996_v39, 0.0  ;;  %vm2102_vm7 = vmand %vm2693_vm1, %vm338_vm12 }
 0x115   :  { %517 = vmax.xlane.f32.xlu1 %v476_v31  ;;  %v2015_v44 = vpop.f32.mrf.mxu0  ;;  %v2027_v48 = vpop.f32.mrf.mxu1  ;;  %v2746_v15 = vsel %vm2102_vm7, 4294967295, %v2745_v15  ;;  %vm2120_vm12 = vmand %vm2693_vm1, %vm341_vm6  ;;  %v2753_v31 = vmov 0 }
 0x116   :  { %v469_v50 = vsel %vm2693_vm1, %v2015_v44, -inf  ;;  %v477_v57 = vsel %vm2693_vm1, %v2027_v48, -inf  ;;  %v870_v3 = vsel %vm2060_vm2, %v2015_v44, 0.0  ;;  %v2750_v27 = vsel %vm2120_vm12, 4294967295, %v2749_v27  ;;  %vm2137_vm6 = vmand %vm2693_vm1, %vm342_vm11 }
 0x117   :  { %515 = vmax.xlane.f32.xlu0 %v475_v36  ;;  %v2029_v49 = vpop.f32.mrf.mxu0  ;;  %v2048_v55 = vpop.f32.mrf.mxu1  ;;  %v2754_v31 = vsel %vm2137_vm6, 4294967295, %v2753_v31 }
 0x118   :  { %v472_v51 = vsel %vm2693_vm1, %v2029_v49, -inf  ;;  %v480_v58 = vsel %vm2693_vm1, %v2048_v55, -inf }
 0x119   :  { %886 = vadd.xlane.f32.xlu1 %v869_v37  ;;  %v2050_v56 = vpop.f32.mrf.mxu0  ;;  %v2065_v63 = vpop.f32.mrf.mxu1 }
 0x11a   :  { %v471_v12 = vsel %vm2693_vm1, %v2050_v56, -inf  ;;  %v479_v14 = vsel %vm2693_vm1, %v2065_v63, -inf }
 0x11b   :  { %884 = vadd.xlane.f32.xlu0 %v868_v40  ;;  %v997_v59 = vpop.xlane.xlu1 %996  ;;  %v2067_v1 = vpop.f32.mrf.mxu0 }
 0x11c   :  { %v1028_v62 = vadd.f32 %v997_v59, %v948_v54  ;;  %v474_v8 = vsel %vm2693_vm1, %v2067_v1, -inf  ;;  %v2079_v10 = vpop.f32.mrf.mxu1 }
 0x11d   :  { %521 = vmax.xlane.f32.xlu1 %v478_v41  ;;  %v482_v13 = vsel %vm2693_vm1, %v2079_v10, -inf  ;;  %v301_v41 = vadd.s32 48, %v1876_v4 }
 0x11e   :  { %1044 = vst.msk [vmem:[#allocation5] sm:$0xff] %vm2688_vm0, %v1028_v62  ;;  %vm2108_vm0 = vmand %vm440_vm10, %vm2093_vm8  ;;  %vm443_vm8 = vcmp.eq.s32.totalorder %v1916_v18, %v1886_v6 }
 0x11f   :  { %505 = vmax.xlane.f32.xlu0 %v470_v43  ;;  %vm2126_vm10 = vmand %vm439_vm9, %vm2102_vm7  ;;  %v873_v17 = vsel %vm2108_vm0, %v2029_v49, 0.0  ;;  %v2163_v43 = vpop.f32.mrf.mxu0 }
 0x120   :  { %vm2143_vm9 = vmand %vm442_vm15, %vm2120_vm12  ;;  %v872_v18 = vsel %vm2126_vm10, %v2050_v56, 0.0  ;;  %v473_v46 = vsel %vm2693_vm1, %v2163_v43, -inf  ;;  %vm441_vm15 = vcmp.eq.s32.totalorder %v1912_v16, %v1886_v6 }
 0x121   :  { %890 = vadd.xlane.f32.xlu1 %v871_v47  ;;  %vm2152_vm7 = vmand %vm443_vm8, %vm2137_vm6  ;;  %v875_v37 = vsel %vm2143_vm9, %v2067_v1, 0.0  ;;  %vm340_vm8 = vcmp.ne.s32.totalorder %v301_v41, %v1878_v5  ;;  %v2169_v47 = vpop.f32.mrf.mxu1 }
 0x122   :  { %v876_v40 = vsel %vm2152_vm7, %v1979_v34, 0.0  ;;  %vm2178_vm11 = vmand %vm2693_vm1, %vm340_vm8  ;;  %vm2764_vm8 = vcmask 7168  }
 0x123   :  { %503 = vmax.xlane.f32.xlu0 %v469_v50  ;;  %v481_v50 = vsel %vm2693_vm1, %v2169_v47, -inf  ;;  %vm2184_vm12 = vmand %vm441_vm15, %vm2178_vm11 }
 0x124   :  { %v874_v16 = vsel %vm2184_vm12, %v2163_v43, 0.0  ;;  %vm2766_vm15 = vmmov %vm2764_vm8 }
 0x125   :  { %509 = vmax.xlane.f32.xlu1 %v472_v51  ;;  %v2759_v51 = vmov 0  ;;  %vm2770_vm1 = vmmov %vm2764_vm8 }
 0x126   :  { %v2760_v51 = vsel %vm2178_vm11, 4294967295, %v2759_v51  ;;  %vm2797_vm11 = vmmov %vm2770_vm1 }
 0x127   :  { %519 = vmax.xlane.f32.xlu0 %v477_v57  ;;  %v2191_v57 = vpop.permute.xlu0 %426 }
 0x129   :  { %525 = vmax.xlane.f32.xlu1 %v480_v58  ;;  %v2193_v58 = vld [vmem:[#allocation2 + $0x8] sm:$0xff] }
 0x12b   :  { %888 = vadd.xlane.f32.xlu0 %v870_v3  ;;  %v2200_v3 = vld [vmem:[#allocation2 + $0x48] sm:$0xff] }
 0x12d   :  { %513 = vmax.xlane.f32.xlu1 %v474_v8 }
 0x12f   :  { %507 = vmax.xlane.f32.xlu0 %v471_v12  ;;  %v2210_v12 = vld [vmem:[#allocation2 + $0x40] sm:$0xff] }
 0x131   :  { %529 = vmax.xlane.f32.xlu1 %v482_v13  ;;  %v2236_v13 = vld [vmem:[#allocation2 + $0x18] sm:$0xff] }
 0x132   :  { %2769 = vst [vmem:[#allocation12_spill] sm:$0xff] %v2236_v13 }
 0x133   :  { %523 = vmax.xlane.f32.xlu0 %v479_v14 }
 0x135   :  { %894 = vadd.xlane.f32.xlu1 %v873_v17 }
 0x137   :  { %892 = vadd.xlane.f32.xlu0 %v872_v18  ;;  %v853_v18 = vld [vmem:[#allocation4 + $0x8] sm:$0xff] }
 0x139   :  { %898 = vadd.xlane.f32.xlu1 %v875_v37 }
 0x13b   :  { %900 = vadd.xlane.f32.xlu0 %v876_v40 }
 0x13f   :  { %511 = vmax.xlane.f32.xlu0 %v473_v46  ;;  %v852_v46 = vld [vmem:[#allocation4] sm:$0xff] }
 0x143   :  { %527 = vmax.xlane.f32.xlu0 %v481_v50 }
 0x147   :  { %896 = vadd.xlane.f32.xlu0 %v874_v16 }
 0x19a   :  { %v502_v59 = vpop.xlane.xlu1 %501 }
 0x19b   :  { %v2198_v62 = vmax.f32 %v2193_v58, %v502_v59 }
 0x19c   :  { %v500_v2 = vpop.xlane.xlu0 %499 }
 0x19d   :  { %837 = vst.msk [vmem:[#allocation2 + $0x8] sm:$0xff] %vm2764_vm8, %v2198_v62  ;;  %v2207_v9 = vmax.f32 %v2195_v61, %v500_v2  ;;  %602 = vperm.xlu1 %1484, %v2198_v62   ;;  %v2232_v2 = vld [vmem:[#allocation2 + $0x58] sm:$0xff] }
 0x19e   :  { %v518_v11 = vpop.xlane.xlu1 %517  ;;  %2768 = vst [vmem:[#allocation11_spill] sm:$0xff] %v2232_v2 }
 0x19f   :  { %2765 = vst [vmem:[#allocation10_spill] sm:$0xff] %v2207_v9  ;;  %836 = vst.msk [vmem:[#allocation2] sm:$0xff] %vm2766_vm15, %v2207_v9  ;;  %v2217_v14 = vmax.f32 %v2200_v3, %v518_v11 }
 0x1a0   :  { %v516_v17 = vpop.xlane.xlu0 %515  ;;  %vm2767_vm15 = vmmov %vm2764_vm8 }
 0x1a1   :  { %845 = vst.msk [vmem:[#allocation2 + $0x48] sm:$0xff] %vm2764_vm8, %v2217_v14  ;;  %v2224_v40 = vmax.f32 %v2210_v12, %v516_v17  ;;  %642 = vperm.xlu0 %1483, %v2217_v14  }
 0x1a2   :  { %v887_v41 = vpop.xlane.xlu1 %886 }
 0x1a3   :  { %844 = vst.msk [vmem:[#allocation2 + $0x40] sm:$0xff] %vm2767_vm15, %v2224_v40  ;;  %v917_v16 = vadd.f32 %v887_v41, %v853_v18  ;;  %637 = vperm.xlu1 %1484, %v2224_v40   ;;  %v855_v18 = vld [vmem:[#allocation4 + $0x18] sm:$0xff]  ;;  %vm2772_vm15 = vmmov %vm2770_vm1  ;;  %v2256_v41 = vld [vmem:[#allocation2 + $0x28] sm:$0xff] }
 0x1a4   :  { %v885_v59 = vpop.xlane.xlu0 %884  ;;  %2775 = vst [vmem:[#allocation16_spill] sm:$0xff] %v2256_v41 }
 0x1a5   :  { %933 = vst.msk [vmem:[#allocation4 + $0x8] sm:$0xff] %vm2764_vm8, %v917_v16  ;;  %v916_v11 = vadd.f32 %v885_v59, %v852_v46  ;;  %597 = vperm.xlu0 %1483, %v2207_v9   ;;  %v2249_v59 = vld [vmem:[#allocation2 + $0x10] sm:$0xff]  ;;  %vm2776_vm8 = vmmov %vm2770_vm1 }
 0x1a6   :  { %v522_v17 = vpop.xlane.xlu1 %521  ;;  %2774 = vst [vmem:[#allocation15_spill] sm:$0xff] %v2249_v59 }
 0x1a7   :  { %932 = vst.msk [vmem:[#allocation4] sm:$0xff] %vm2770_vm1, %v916_v11  ;;  %v2240_v50 = vmax.f32 %v2232_v2, %v522_v17  ;;  %v2262_v2 = vld [vmem:[#allocation2 + $0x50] sm:$0xff] }
 0x1a8   :  { %v506_v37 = vpop.xlane.xlu0 %505  ;;  %2778 = vst [vmem:[#allocation18_spill] sm:$0xff] %v2262_v2 }
 0x1a9   :  { %2771 = vst [vmem:[#allocation13_spill] sm:$0xff] %v2240_v50  ;;  %847 = vst.msk [vmem:[#allocation2 + $0x58] sm:$0xff] %vm2772_vm15, %v2240_v50  ;;  %v2247_v46 = vmax.f32 %v2236_v13, %v506_v37  ;;  %v860_v13 = vld [vmem:[#allocation4 + $0x40] sm:$0xff] }
 0x1aa   :  { %v891_v16 = vpop.xlane.xlu1 %890  ;;  %vm2779_vm15 = vmmov %vm2770_vm1 }
 0x1ab   :  { %2773 = vst [vmem:[#allocation14_spill] sm:$0xff] %v2247_v46  ;;  %839 = vst.msk [vmem:[#allocation2 + $0x18] sm:$0xff] %vm2770_vm1, %v2247_v46  ;;  %v919_v17 = vadd.f32 %v891_v16, %v855_v18  ;;  %612 = vperm.xlu0 %1483, %v2247_v46   ;;  %v854_v46 = vld [vmem:[#allocation4 + $0x10] sm:$0xff] }
 0x1ac   :  { %v504_v8 = vpop.xlane.xlu0 %503 }
 0x1ad   :  { %935 = vst.msk [vmem:[#allocation4 + $0x18] sm:$0xff] %vm2776_vm8, %v919_v17  ;;  %v2260_v37 = vmax.f32 %v2249_v59, %v504_v8  ;;  %v2273_v17 = vld [vmem:[#allocation2 + $0x68] sm:$0xff]  ;;  %vm2783_vm8 = vmmov %vm2770_vm1 }
 0x1ae   :  { %v510_v0 = vpop.xlane.xlu1 %509  ;;  %2781 = vst [vmem:[#allocation20_spill] sm:$0xff] %v2273_v17 }
 0x1af   :  { %2777 = vst [vmem:[#allocation17_spill] sm:$0xff] %v2260_v37  ;;  %838 = vst.msk [vmem:[#allocation2 + $0x10] sm:$0xff] %vm2779_vm15, %v2260_v37  ;;  %v2269_v18 = vmax.f32 %v2256_v41, %v510_v0  ;;  %607 = vperm.xlu1 %1484, %v2260_v37   ;;  %652 = vperm.xlu0 %1483, %v2240_v50   ;;  %v2291_v41 = vld [vmem:[#allocation2 + $0x38] sm:$0xff]  ;;  %v2297_v37 = vld [vmem:[#allocation2 + $0x20] sm:$0xff] }
 0x1b0   :  { %v520_v16 = vpop.xlane.xlu0 %519  ;;  %2785 = vst [vmem:[#allocation23_spill] sm:$0xff] %v2291_v41  ;;  %vm2786_vm15 = vmmov %vm2770_vm1 }
 0x1b1   :  { %2780 = vst [vmem:[#allocation19_spill] sm:$0xff] %v2269_v18  ;;  %841 = vst.msk [vmem:[#allocation2 + $0x28] sm:$0xff] %vm2770_vm1, %v2269_v18  ;;  %v2280_v11 = vmax.f32 %v2262_v2, %v520_v16 }
 0x1b2   :  { %v526_v59 = vpop.xlane.xlu1 %525  ;;  %2787 = vst [vmem:[#allocation24_spill] sm:$0xff] %v2297_v37 }
 0x1b3   :  { %2782 = vst [vmem:[#allocation21_spill] sm:$0xff] %v2280_v11  ;;  %846 = vst.msk [vmem:[#allocation2 + $0x50] sm:$0xff] %vm2783_vm8, %v2280_v11  ;;  %v2287_v50 = vmax.f32 %v2273_v17, %v526_v59  ;;  %647 = vperm.xlu1 %1484, %v2280_v11   ;;  %622 = vperm.xlu0 %1483, %v2269_v18   ;;  %v2304_v11 = vld [vmem:[#allocation2 + $0x78] sm:$0xff]  ;;  %v2313_v17 = vld [vmem:[#allocation2 + $0x60] sm:$0xff] }
 0x1b4   :  { %v889_v8 = vpop.xlane.xlu0 %888  ;;  %2789 = vst [vmem:[#allocation26_spill] sm:$0xff] %v2304_v11  ;;  %vm2790_vm8 = vmmov %vm2770_vm1 }
 0x1b5   :  { %2784 = vst [vmem:[#allocation22_spill] sm:$0xff] %v2287_v50  ;;  %849 = vst.msk [vmem:[#allocation2 + $0x68] sm:$0xff] %vm2786_vm15, %v2287_v50  ;;  %v918_v0 = vadd.f32 %v889_v8, %v854_v46 }
 0x1b6   :  { %v514_v2 = vpop.xlane.xlu1 %513  ;;  %2792 = vst [vmem:[#allocation28_spill] sm:$0xff] %v2313_v17  ;;  %vm2793_vm15 = vmmov %vm2770_vm1 }
 0x1b7   :  { %934 = vst.msk [vmem:[#allocation4 + $0x10] sm:$0xff] %vm2770_vm1, %v918_v0  ;;  %v2301_v59 = vmax.f32 %v2291_v41, %v514_v2  ;;  %662 = vperm.xlu0 %1483, %v2287_v50   ;;  %v857_v41 = vld [vmem:[#allocation4 + $0x28] sm:$0xff]  ;;  %v856_v50 = vld [vmem:[#allocation4 + $0x20] sm:$0xff] }
 0x1b8   :  { %v508_v18 = vpop.xlane.xlu0 %507 }
 0x1b9   :  { %2788 = vst [vmem:[#allocation25_spill] sm:$0xff] %v2301_v59  ;;  %843 = vst.msk [vmem:[#allocation2 + $0x38] sm:$0xff] %vm2790_vm8, %v2301_v59  ;;  %v2311_v46 = vmax.f32 %v2297_v37, %v508_v18 }
 0x1ba   :  { %v530_v8 = vpop.xlane.xlu1 %529  ;;  %vm2795_vm8 = vmmov %vm2770_vm1 }
 0x1bb   :  { %2791 = vst [vmem:[#allocation27_spill] sm:$0xff] %v2311_v46  ;;  %840 = vst.msk [vmem:[#allocation2 + $0x20] sm:$0xff] %vm2793_vm15, %v2311_v46  ;;  %v2320_v0 = vmax.f32 %v2304_v11, %v530_v8  ;;  %617 = vperm.xlu1 %1484, %v2311_v46   ;;  %632 = vperm.xlu0 %1483, %v2301_v59   ;;  %v859_v11 = vld [vmem:[#allocation4 + $0x38] sm:$0xff] }
 0x1bc   :  { %v524_v16 = vpop.xlane.xlu0 %523  ;;  %vm2796_vm15 = vmmov %vm2770_vm1 }
 0x1bd   :  { %2794 = vst [vmem:[#allocation29_spill] sm:$0xff] %v2320_v0  ;;  %851 = vst.msk [vmem:[#allocation2 + $0x78] sm:$0xff] %vm2770_vm1, %v2320_v0  ;;  %v2329_v2 = vmax.f32 %v2313_v17, %v524_v16  ;;  %v2340_v17 = vld [vmem:[#allocation2 + $0x30] sm:$0xff] }
 0x1be   :  { %v895_v37 = vpop.xlane.xlu1 %894 }
 0x1bf   :  { %848 = vst.msk [vmem:[#allocation2 + $0x60] sm:$0xff] %vm2795_vm8, %v2329_v2  ;;  %v921_v59 = vadd.f32 %v895_v37, %v857_v41  ;;  %657 = vperm.xlu1 %1484, %v2329_v2   ;;  %672 = vperm.xlu0 %1483, %v2320_v0   ;;  %vm2798_vm8 = vmmov %vm2770_vm1  ;;  %v2346_v0 = vld [vmem:[#allocation2 + $0x70] sm:$0xff] }
 0x1c0   :  { %v893_v18 = vpop.xlane.xlu0 %892 }
 0x1c1   :  { %937 = vst.msk [vmem:[#allocation4 + $0x28] sm:$0xff] %vm2796_vm15, %v921_v59  ;;  %v920_v46 = vadd.f32 %v893_v18, %v856_v50  ;;  %vm2799_vm15 = vmmov %vm2770_vm1 }
 0x1c2   :  { %v899_v16 = vpop.xlane.xlu1 %898 }
 0x1c3   :  { %936 = vst.msk [vmem:[#allocation4 + $0x20] sm:$0xff] %vm2770_vm1, %v920_v46  ;;  %v923_v9 = vadd.f32 %v899_v16, %v859_v11  ;;  %v305_v46 = vadd.s32 80, %v1876_v4  ;;  %v2802_v16 = vmov 0 }
 0x1c4   :  { %v901_v61 = vpop.xlane.xlu0 %900 }
 0x1c5   :  { %939 = vst.msk [vmem:[#allocation4 + $0x38] sm:$0xff] %vm2797_vm11, %v923_v9  ;;  %v924_v8 = vadd.f32 %v901_v61, %v860_v13  ;;  %v858_v13 = vld [vmem:[#allocation4 + $0x30] sm:$0xff]  ;;  %vm2800_vm11 = vmmov %vm2770_vm1 }
 0x1c7   :  { %940 = vst.msk [vmem:[#allocation4 + $0x40] sm:$0xff] %vm2798_vm8, %v924_v8  ;;  %vm344_vm8 = vcmp.ne.s32.totalorder %v305_v46, %v1878_v5  ;;  %v307_v8 = vadd.s32 96, %v1876_v4 }
 0x1c8   :  { %v512_v41 = vpop.xlane.xlu0 %511 }
 0x1c9   :  { %v2344_v37 = vmax.f32 %v2340_v17, %v512_v41 }
 0x1cb   :  { %842 = vst.msk [vmem:[#allocation2 + $0x30] sm:$0xff] %vm2799_vm15, %v2344_v37  ;;  %627 = vperm.xlu1 %1484, %v2344_v37   ;;  %vm2801_vm15 = vcmp.lt.s32.totalorder %v1878_v5, 8 }
 0x1cc   :  { %v528_v9 = vpop.xlane.xlu0 %527  ;;  %vm2367_vm4 = vmand %vm2801_vm15, %vm344_vm8 }
 0x1cd   :  { %v2354_v61 = vmax.f32 %v2346_v0, %v528_v9  ;;  %v2803_v16 = vsel %vm2367_vm4, 4294967295, %v2802_v16  ;;  %vm2377_vm6 = vmand %vm2804_vm3, %vm2367_vm4  ;;  %v309_v9 = vadd.s32 112, %v1876_v4  ;;  %vm2810_vm3 = vcmp.eq.s32.totalorder %v1930_v22, %v1886_v6 }
 0x1ce   :  { %v2815_v22 = vmov 0 }
 0x1cf   :  { %850 = vst.msk [vmem:[#allocation2 + $0x70] sm:$0xff] %vm2800_vm11, %v2354_v61  ;;  %667 = vperm.xlu1 %1484, %v2354_v61   ;;  %vm346_vm11 = vcmp.ne.s32.totalorder %v307_v8, %v1878_v5  ;;  %v304_v8 = vadd.s32 72, %v1876_v4 }
 0x1d0   :  { %v897_v59 = vpop.xlane.xlu0 %896 }
 0x1d1   :  { %v922_v18 = vadd.f32 %v897_v59, %v858_v13  ;;  %v2808_v13 = vmov 0  ;;  %v878_v59 = vsel %vm2377_vm6, %v2027_v48, 0.0 }
 0x1d3   :  { %938 = vst.msk [vmem:[#allocation4 + $0x30] sm:$0xff] %vm2770_vm1, %v922_v18  ;;  %vm2807_vm1 = vmmov %vm2801_vm15  ;;  %vm348_vm15 = vcmp.ne.s32.totalorder %v309_v9, %v1878_v5  ;;  %v2813_v18 = vmov 0  ;;  %v2817_v9 = vmov 0.0  }
 0x1d4   :  { %vm2384_vm13 = vmand %vm2807_vm1, %vm346_vm11  ;;  %vm449_vm11 = vcmp.eq.s32.totalorder %v2191_v57, %v1886_v6  ;;  %v1344_v50 = vsel %vm2019_vm5, 1.0, %v2817_v9  ;;  %v1346_v45 = vsel %vm2108_vm0, 1.0, %v2817_v9  ;;  %vm347_vm5 = vcmp.ne.s32.totalorder %v308_v35, %v1878_v5 }
 0x1d5   :  { %v2809_v13 = vsel %vm2384_vm13, 4294967295, %v2808_v13  ;;  %vm2396_vm8 = vmand %vm2810_vm3, %vm2384_vm13  ;;  %v1351_v60 = vsel %vm2377_vm6, 1.0, %v2817_v9  ;;  %vm2846_vm6 = vnez %v2803_v16 }
 0x1d6   :  { %v880_v46 = vsel %vm2396_vm8, %v2065_v63, 0.0  ;;  %vm2408_vm4 = vmand %vm2807_vm1, %vm348_vm15  ;;  %vm343_vm15 = vcmp.ne.s32.totalorder %v304_v8, %v1878_v5  ;;  %v2825_v8 = vmov 0  ;;  %v1353_v30 = vsel %vm2396_vm8, 1.0, %v2817_v9 }
 0x1d7   :  { %v2814_v18 = vsel %vm2408_vm4, 4294967295, %v2813_v18  ;;  %vm2414_vm3 = vmand %vm449_vm11, %vm2408_vm4  ;;  %vm2847_vm8 = vnez %v2744_v24 }
 0x1d8   :  { %v2816_v22 = vsel %vm2414_vm3, 4294967295, %v2815_v22  ;;  %v882_v57 = vsel %vm2414_vm3, %v2169_v47, 0.0  ;;  %vm2818_vm11 = vmmov %vm2807_vm1 }
 0x1d9   :  { %vm2429_vm1 = vmand %vm2818_vm11, %vm343_vm15 }
 0x1da   :  { %vm2824_vm15 = vmmov %vm2818_vm11 }
 0x1db   :  { %vm2830_vm0 = vmmov %vm2824_vm15 }
 0x1de   :  { %904 = vadd.xlane.f32.xlu0 %v878_v59  ;;  %v1342_v59 = vsel %vm1983_vm14, 1.0, %v2817_v9  ;;  %vm2821_vm14 = vcmp.eq.s32.totalorder %v1918_v19, %v1886_v6 }
 0x1df   :  { %vm2443_vm4 = vmand %vm2821_vm14, %vm2429_vm1 }
 0x1e0   :  { %v877_v19 = vsel %vm2443_vm4, %v1961_v28, 0.0  ;;  %v1350_v35 = vsel %vm2443_vm4, 1.0, %v2817_v9  ;;  %vm2842_vm4 = vnez %v2728_v7 }
 0x1e2   :  { %908 = vadd.xlane.f32.xlu0 %v880_v46  ;;  %v306_v46 = vadd.s32 88, %v1876_v4 }
 0x1e4   :  { %vm345_vm3 = vcmp.ne.s32.totalorder %v306_v46, %v1878_v5 }
 0x1e5   :  { %vm2449_vm11 = vmand %vm2824_vm15, %vm345_vm3  ;;  %vm2827_vm3 = vcmp.eq.s32.totalorder %v1924_v21, %v1886_v6 }
 0x1e6   :  { %912 = vadd.xlane.f32.xlu0 %v882_v57  ;;  %v2826_v8 = vsel %vm2449_vm11, 4294967295, %v2825_v8  ;;  %vm2466_vm14 = vmand %vm2827_vm3, %vm2449_vm11  ;;  %v1343_v57 = vsel %vm2060_vm2, 1.0, %v2817_v9  ;;  %vm2843_vm2 = vnez %v2736_v42 }
 0x1e7   :  { %vm2472_vm15 = vmand %vm2830_vm0, %vm347_vm5  ;;  %v879_v21 = vsel %vm2466_vm14, %v1994_v38, 0.0  ;;  %vm2833_vm5 = vcmp.eq.s32.totalorder %v1934_v23, %v1886_v6 }
 0x1e8   :  { %vm2488_vm3 = vmand %vm2833_vm5, %vm2472_vm15 }
 0x1e9   :  { %v881_v23 = vsel %vm2488_vm3, %v2048_v55, 0.0 }
 0x1ea   :  { %998 = vadd.xlane.f32.xlu0 %v1342_v59 }
 0x1ee   :  { %1002 = vadd.xlane.f32.xlu0 %v1344_v50  ;;  %v310_v50 = vadd.s32 120, %v1876_v4  ;;  %v1348_v4 = vsel %vm2143_vm9, 1.0, %v2817_v9  ;;  %vm450_vm9 = vcmp.eq.s32.totalorder %v2038_v52, %v1886_v6 }
 0x1f0   :  { %vm349_vm13 = vcmp.ne.s32.totalorder %v310_v50, %v1878_v5  ;;  %v1352_v5 = vsel %vm2466_vm14, 1.0, %v2817_v9  ;;  %v1347_v50 = vsel %vm2184_vm12, 1.0, %v2817_v9  ;;  %vm2844_vm12 = vnez %v2740_v53 }
 0x1f1   :  { %vm2496_vm11 = vmand %vm2830_vm0, %vm349_vm13  ;;  %vm2841_vm13 = vnez %v2754_v31  ;;  %vm2849_vm14 = vnez %v2750_v27  ;;  %vm2853_vm0 = vnez %v2816_v22 }
 0x1f2   :  { %1006 = vadd.xlane.f32.xlu0 %v1346_v45  ;;  %vm2508_vm5 = vmand %vm450_vm9, %vm2496_vm11  ;;  %v1345_v45 = vsel %vm2126_vm10, 1.0, %v2817_v9  ;;  %vm2845_vm10 = vnez %v2826_v8  ;;  %vm2852_vm9 = vnez %v2814_v18  ;;  %v1355_v33 = vsel %vm2853_vm0, 1.0, %v2817_v9 }
 0x1f3   :  { %902 = vadd.xlane.f32.xlu1 %v877_v19  ;;  %v883_v52 = vsel %vm2508_vm5, %v2079_v10, 0.0  ;;  %v1349_v19 = vsel %vm2152_vm7, 1.0, %v2817_v9  ;;  %vm2840_vm7 = vnez %v2732_v32 }
 0x1f6   :  { %1010 = vadd.xlane.f32.xlu0 %v1348_v4 }
 0x1f7   :  { %906 = vadd.xlane.f32.xlu1 %v879_v21 }
 0x1fa   :  { %1014 = vadd.xlane.f32.xlu0 %v1350_v35 }
 0x1fb   :  { %910 = vadd.xlane.f32.xlu1 %v881_v23 }
 0x1fe   :  { %1018 = vadd.xlane.f32.xlu0 %v1352_v5 }
 0x1ff   :  { %914 = vadd.xlane.f32.xlu1 %v883_v52 }
 0x203   :  { %1000 = vadd.xlane.f32.xlu1 %v1343_v57 }
 0x207   :  { %1004 = vadd.xlane.f32.xlu1 %v1345_v45 }
 0x20b   :  { %1008 = vadd.xlane.f32.xlu1 %v1347_v50 }
 0x20f   :  { %1012 = vadd.xlane.f32.xlu1 %v1349_v19 }
 0x213   :  { %1016 = vadd.xlane.f32.xlu1 %v1351_v60 }
 0x217   :  { %1020 = vadd.xlane.f32.xlu1 %v1353_v30 }
 0x218   :  { %v603_v59 = vpop.permute.xlu1 %602 }
 0x219   :  { %v676_v54 = vsub.f32 %v1955_v26, %v603_v59 }
 0x21b   :  { %v693_v4 = vmul.f32 1.442695, %v676_v54 }
 0x21c   :  { %v643_v21 = vpop.permute.xlu0 %642 }
 0x21d   :  { %1485 = vpow2.f32 %v693_v4  ;;  %v684_v36 = vsub.f32 %v1961_v28, %v643_v21 }
 0x21e   :  { %v638_v35 = vpop.permute.xlu1 %637 }
 0x21f   :  { %v709_v23 = vmul.f32 1.442695, %v684_v36  ;;  %v683_v5 = vsub.f32 %v1979_v34, %v638_v35 }
 0x220   :  { %v598_v41 = vpop.permute.xlu0 %597 }
 0x221   :  { %1487 = vpow2.f32 %v709_v23  ;;  %v707_v52 = vmul.f32 1.442695, %v683_v5  ;;  %v675_v57 = vsub.f32 %v1963_v29, %v598_v41 }
 0x223   :  { %1489 = vpow2.f32 %v707_v52  ;;  %v691_v20 = vmul.f32 1.442695, %v675_v57 }
 0x225   :  { %1491 = vpow2.f32 %v691_v20 }
 0x226   :  { %v613_v45 = vpop.permute.xlu0 %612 }
 0x227   :  { %v678_v26 = vsub.f32 %v1996_v39, %v613_v45 }
 0x229   :  { %v697_v50 = vmul.f32 1.442695, %v678_v26  ;;  %v1354_v26 = vsel %vm2488_vm3, 1.0, %v2817_v9  ;;  %vm2851_vm3 = vnez %v2760_v51 }
 0x22a   :  { %v1486_v19 = vpop.eup %1485  ;;  %v608_v60 = vpop.permute.xlu1 %607 }
 0x22b   :  { %v653_v30 = vpop.permute.xlu0 %652  ;;  %1493 = vpow2.f32 %v697_v50  ;;  %v677_v28 = vsub.f32 %v2015_v44, %v608_v60  ;;  %v724_v59 = vsel %vm2840_vm7, %v1486_v19, 0.0 }
 0x22c   :  { %v686_v34 = vsub.f32 %v1994_v38, %v653_v30  ;;  %773 = vadd.xlane.f32.xlu0 %v724_v59 }
 0x22d   :  { %v695_v29 = vmul.f32 1.442695, %v677_v28 }
 0x22e   :  { %v713_v54 = vmul.f32 1.442695, %v686_v34  ;;  %v1488_v4 = vpop.eup %1487  ;;  %v648_v21 = vpop.permute.xlu1 %647 }
 0x22f   :  { %v623_v36 = vpop.permute.xlu0 %622  ;;  %1495 = vpow2.f32 %v695_v29  ;;  %v685_v39 = vsub.f32 %v2027_v48, %v648_v21  ;;  %v732_v23 = vsel %vm2429_vm1, %v1488_v4, 0.0  ;;  %vm2848_vm1 = vnez %v2746_v15 }
 0x230   :  { %v680_v35 = vsub.f32 %v2029_v49, %v623_v36  ;;  %v1490_v44 = vpop.eup %1489  ;;  %1497 = vpow2.f32 %v713_v54  ;;  %789 = vadd.xlane.f32.xlu0 %v732_v23 }
 0x231   :  { %v711_v38 = vmul.f32 1.442695, %v685_v39  ;;  %v731_v5 = vsel %vm2841_vm13, %v1490_v44, 0.0 }
 0x232   :  { %v701_v32 = vmul.f32 1.442695, %v680_v35  ;;  %v1492_v41 = vpop.eup %1491  ;;  %787 = vadd.xlane.f32.xlu1 %v731_v5 }
 0x233   :  { %v663_v52 = vpop.permute.xlu0 %662  ;;  %1499 = vpow2.f32 %v711_v38  ;;  %v723_v48 = vsel %vm2842_vm4, %v1492_v41, 0.0 }
 0x234   :  { %v688_v57 = vsub.f32 %v2048_v55, %v663_v52  ;;  %1501 = vpow2.f32 %v701_v32  ;;  %771 = vadd.xlane.f32.xlu0 %v723_v48 }
 0x236   :  { %v717_v49 = vmul.f32 1.442695, %v688_v57  ;;  %v618_v11 = vpop.permute.xlu1 %617  ;;  %v862_v57 = vld [vmem:[#allocation4 + $0x50] sm:$0xff] }
 0x237   :  { %v633_v20 = vpop.permute.xlu0 %632  ;;  %v679_v45 = vsub.f32 %v2050_v56, %v618_v11 }
 0x238   :  { %1503 = vpow2.f32 %v717_v49  ;;  %v682_v31 = vsub.f32 %v2067_v1, %v633_v20  ;;  %v1494_v50 = vpop.eup %1493  ;;  %1022 = vadd.xlane.f32.xlu0 %v1354_v26  ;;  %v864_v49 = vld [vmem:[#allocation4 + $0x60] sm:$0xff]  ;;  %v866_v20 = vld [vmem:[#allocation4 + $0x70] sm:$0xff] }
 0x239   :  { %v699_v55 = vmul.f32 1.442695, %v679_v45  ;;  %v726_v56 = vsel %vm2843_vm2, %v1494_v50, 0.0 }
 0x23a   :  { %v705_v19 = vmul.f32 1.442695, %v682_v31  ;;  %v658_v7 = vpop.permute.xlu1 %657  ;;  %v949_v31 = vld [vmem:[#allocation5 + $0x8] sm:$0xff] }
 0x23b   :  { %v673_v60 = vpop.permute.xlu0 %672  ;;  %1505 = vpow2.f32 %v699_v55  ;;  %v687_v30 = vsub.f32 %v2065_v63, %v658_v7  ;;  %v861_v7 = vld [vmem:[#allocation4 + $0x48] sm:$0xff] }
 0x23c   :  { %v690_v28 = vsub.f32 %v2079_v10, %v673_v60  ;;  %v1496_v34 = vpop.eup %1495  ;;  %1507 = vpow2.f32 %v705_v19  ;;  %777 = vadd.xlane.f32.xlu0 %v726_v56  ;;  %v953_v19 = vld [vmem:[#allocation5 + $0x28] sm:$0xff] }
 0x23d   :  { %v1498_v1 = vpop.eup %1497  ;;  %v715_v46 = vmul.f32 1.442695, %v687_v30  ;;  %v725_v29 = vsel %vm2844_vm12, %v1496_v34, 0.0  ;;  %v955_v34 = vld [vmem:[#allocation5 + $0x38] sm:$0xff] }
 0x23e   :  { %v721_v59 = vmul.f32 1.442695, %v690_v28  ;;  %775 = vadd.xlane.f32.xlu1 %v725_v29  ;;  %v734_v54 = vsel %vm2845_vm10, %v1498_v1, 0.0  ;;  %v863_v1 = vld [vmem:[#allocation4 + $0x58] sm:$0xff] }
 0x23f   :  { %1509 = vpow2.f32 %v715_v46 }
 0x240   :  { %v1500_v63 = vpop.eup %1499  ;;  %1511 = vpow2.f32 %v721_v59  ;;  %793 = vadd.xlane.f32.xlu0 %v734_v54 }
 0x241   :  { %v1502_v10 = vpop.eup %1501  ;;  %v733_v42 = vsel %vm2846_vm6, %v1500_v63, 0.0  ;;  %v957_v63 = vld [vmem:[#allocation5 + $0x48] sm:$0xff] }
 0x242   :  { %791 = vadd.xlane.f32.xlu1 %v733_v42  ;;  %v728_v4 = vsel %vm2847_vm8, %v1502_v10, 0.0  ;;  %v865_v10 = vld [vmem:[#allocation4 + $0x68] sm:$0xff] }
 0x244   :  { %781 = vadd.xlane.f32.xlu0 %v728_v4 }
 0x245   :  { %v1504_v21 = vpop.eup %1503 }
 0x246   :  { %v628_v53 = vpop.permute.xlu1 %627  ;;  %v736_v8 = vsel %vm2472_vm15, %v1504_v21, 0.0  ;;  %vm2850_vm15 = vnez %v2809_v13 }
 0x247   :  { %v681_v36 = vsub.f32 %v2163_v43, %v628_v53 }
 0x248   :  { %v1506_v39 = vpop.eup %1505  ;;  %797 = vadd.xlane.f32.xlu0 %v736_v8  ;;  %v867_v8 = vld [vmem:[#allocation4 + $0x78] sm:$0xff] }
 0x249   :  { %v1508_v35 = vpop.eup %1507  ;;  %v703_v23 = vmul.f32 1.442695, %v681_v36  ;;  %v727_v16 = vsel %vm2848_vm1, %v1506_v39, 0.0  ;;  %v959_v36 = vld [vmem:[#allocation5 + $0x58] sm:$0xff] }
 0x24a   :  { %779 = vadd.xlane.f32.xlu1 %v727_v16  ;;  %v668_v44 = vpop.permute.xlu1 %667  ;;  %v730_v38 = vsel %vm2849_vm14, %v1508_v35, 0.0 }
 0x24b   :  { %1513 = vpow2.f32 %v703_v23  ;;  %v689_v24 = vsub.f32 %v2169_v47, %v668_v44  ;;  %v1356_v47 = vsel %vm2508_vm5, 1.0, %v2817_v9  ;;  %v951_v9 = vld [vmem:[#allocation5 + $0x18] sm:$0xff]  ;;  %v950_v44 = vld [vmem:[#allocation5 + $0x10] sm:$0xff] }
 0x24c   :  { %v1510_v32 = vpop.eup %1509  ;;  %785 = vadd.xlane.f32.xlu0 %v730_v38 }
 0x24d   :  { %v1512_v43 = vpop.eup %1511  ;;  %v719_v25 = vmul.f32 1.442695, %v689_v24  ;;  %v735_v5 = vsel %vm2850_vm15, %v1510_v32, 0.0  ;;  %v952_v32 = vld [vmem:[#allocation5 + $0x20] sm:$0xff] }
 0x24e   :  { %795 = vadd.xlane.f32.xlu1 %v735_v5  ;;  %v738_v15 = vsel %vm2496_vm11, %v1512_v43, 0.0  ;;  %vm2854_vm11 = vcmask 7168   ;;  %v954_v5 = vld [vmem:[#allocation5 + $0x30] sm:$0xff] }
 0x24f   :  { %1515 = vpow2.f32 %v719_v25  ;;  %vm2855_vm5 = vmmov %vm2854_vm11 }
 0x250   :  { %801 = vadd.xlane.f32.xlu0 %v738_v15  ;;  %vm2856_vm7 = vmmov %vm2855_vm5 }
 0x251   :  { %vm2857_vm13 = vmmov %vm2855_vm5 }
 0x252   :  { %vm2858_vm4 = vmmov %vm2855_vm5 }
 0x253   :  { %vm2859_vm2 = vmmov %vm2858_vm4 }
 0x254   :  { %1026 = vadd.xlane.f32.xlu0 %v1356_v47  ;;  %vm2860_vm12 = vmmov %vm2859_vm2 }
 0x255   :  { %vm2861_vm10 = vmmov %vm2859_vm2 }
 0x256   :  { %vm2862_vm6 = vmmov %vm2859_vm2 }
 0x257   :  { %vm2863_vm8 = vmmov %vm2859_vm2 }
 0x258   :  { %v1514_v27 = vpop.eup %1513  ;;  %vm2864_vm1 = vmmov %vm2859_vm2 }
 0x259   :  { %v729_v41 = vsel %vm2851_vm3, %v1514_v27, 0.0  ;;  %vm2865_vm14 = vmmov %vm2864_vm1  ;;  %v956_v27 = vld [vmem:[#allocation5 + $0x40] sm:$0xff] }
 0x25a   :  { %783 = vadd.xlane.f32.xlu1 %v729_v41  ;;  %vm2866_vm15 = vmmov %vm2864_vm1 }
 0x25b   :  { %vm2867_vm3 = vmmov %vm2864_vm1 }
 0x25c   :  { %v1516_v52 = vpop.eup %1515  ;;  %vm2869_vm0 = vmmov %vm2864_vm1 }
 0x25d   :  { %v737_v13 = vsel %vm2852_vm9, %v1516_v52, 0.0  ;;  %vm2868_vm9 = vmmov %vm2864_vm1 }
 0x25e   :  { %799 = vadd.xlane.f32.xlu1 %v737_v13  ;;  %v958_v13 = vld [vmem:[#allocation5 + $0x50] sm:$0xff] }
 0x262   :  { %1024 = vadd.xlane.f32.xlu1 %v1355_v33 }
 0x267   :  { %v905_v48 = vpop.xlane.xlu0 %904 }
 0x268   :  { %v926_v6 = vadd.f32 %v905_v48, %v862_v57  ;;  %v960_v48 = vld [vmem:[#allocation5 + $0x60] sm:$0xff] }
 0x26a   :  { %942 = vst.msk [vmem:[#allocation4 + $0x50] sm:$0xff] %vm2854_vm11, %v926_v6  ;;  %vm2870_vm11 = vmmov %vm2869_vm0  ;;  %v2872_v6 = vsub.f32 %v2193_v58, %v2198_v62  ;;  %v2879_v58 = vld [vmem:[#allocation12_spill] sm:$0xff]  ;;  %v2880_v62 = vld [vmem:[#allocation14_spill] sm:$0xff] }
 0x26b   :  { %v909_v11 = vpop.xlane.xlu0 %908 }
 0x26c   :  { %v928_v51 = vadd.f32 %v909_v11, %v864_v49  ;;  %v565_v49 = vmul.f32 1.442695, %v2872_v6 }
 0x26e   :  { %944 = vst.msk [vmem:[#allocation4 + $0x60] sm:$0xff] %vm2855_vm5, %v928_v51  ;;  %vm2871_vm5 = vmmov %vm2869_vm0  ;;  %1517 = vpow2.f32 %v565_v49  ;;  %v961_v49 = vld [vmem:[#allocation5 + $0x68] sm:$0xff] }
 0x26f   :  { %v913_v45 = vpop.xlane.xlu0 %912 }
 0x270   :  { %v930_v18 = vadd.f32 %v913_v45, %v866_v20  ;;  %v2874_v20 = vsub.f32 %v2200_v3, %v2217_v14  ;;  %v2883_v3 = vld [vmem:[#allocation17_spill] sm:$0xff] }
 0x272   :  { %946 = vst.msk [vmem:[#allocation4 + $0x70] sm:$0xff] %vm2856_vm7, %v930_v18  ;;  %vm2873_vm7 = vmmov %vm2869_vm0  ;;  %v581_v45 = vmul.f32 1.442695, %v2874_v20  ;;  %v2875_v18 = vsub.f32 %v2210_v12, %v2224_v40  ;;  %v2886_v12 = vld [vmem:[#allocation13_spill] sm:$0xff] }
 0x273   :  { %v999_v26 = vpop.xlane.xlu0 %998  ;;  %v2904_v20 = vld [vmem:[#allocation25_spill] sm:$0xff] }
 0x274   :  { %v1029_v22 = vadd.f32 %v999_v26, %v949_v31  ;;  %v579_v31 = vmul.f32 1.442695, %v2875_v18  ;;  %v2876_v26 = vld [vmem:[#allocation9_spill] sm:$0xff]  ;;  %1519 = vpow2.f32 %v581_v45 }
 0x276   :  { %1045 = vst.msk [vmem:[#allocation5 + $0x8] sm:$0xff] %vm2857_vm13, %v1029_v22  ;;  %v2877_v22 = vld [vmem:[#allocation10_spill] sm:$0xff]  ;;  %1521 = vpow2.f32 %v579_v31  ;;  %vm2894_vm13 = vmmov %vm2869_vm0 }
 0x277   :  { %v1003_v50 = vpop.xlane.xlu0 %1002 }
 0x278   :  { %v1031_v55 = vadd.f32 %v1003_v50, %v951_v9  ;;  %v2878_v9 = vsub.f32 %v2876_v26, %v2877_v22  ;;  %v742_v22 = vld [vmem:[#allocation3 + $0x18] sm:$0xff] }
 0x27a   :  { %1047 = vst.msk [vmem:[#allocation5 + $0x18] sm:$0xff] %vm2858_vm4, %v1031_v55  ;;  %v563_v50 = vmul.f32 1.442695, %v2878_v9  ;;  %v2881_v55 = vsub.f32 %v2879_v58, %v2880_v62  ;;  %vm2898_vm4 = vmmov %vm2869_vm0  ;;  %v2907_v9 = vld [vmem:[#allocation28_spill] sm:$0xff] }
 0x27b   :  { %v1007_v60 = vpop.xlane.xlu0 %1006 }
 0x27c   :  { %v1033_v30 = vadd.f32 %v1007_v60, %v953_v19  ;;  %v903_v28 = vpop.xlane.xlu1 %902  ;;  %1523 = vpow2.f32 %v563_v50  ;;  %v569_v19 = vmul.f32 1.442695, %v2881_v55  ;;  %v740_v60 = vld [vmem:[#allocation3 + $0x8] sm:$0xff]  ;;  %v2908_v50 = vsub.f32 %v2907_v9, %v2329_v2 }
 0x27d   :  { %v925_v56 = vadd.f32 %v903_v28, %v861_v7  ;;  %v1518_v7 = vpop.eup %1517 }
 0x27e   :  { %1049 = vst.msk [vmem:[#allocation5 + $0x28] sm:$0xff] %vm2859_vm2, %v1033_v30  ;;  %v2882_v30 = vld [vmem:[#allocation15_spill] sm:$0xff]  ;;  %1525 = vpow2.f32 %v569_v19  ;;  %vm2902_vm2 = vmmov %vm2869_vm0  ;;  %v587_v58 = vmul.f32 1.442695, %v2908_v50 }
 0x27f   :  { %941 = vst.msk [vmem:[#allocation4 + $0x48] sm:$0xff] %vm2860_vm12, %v925_v56  ;;  %v1011_v46 = vpop.xlane.xlu0 %1010  ;;  %v2884_v14 = vsub.f32 %v2882_v30, %v2883_v3  ;;  %v2885_v56 = vld [vmem:[#allocation11_spill] sm:$0xff]  ;;  %vm2906_vm12 = vmmov %vm2869_vm0  ;;  %v2910_v30 = vld [vmem:[#allocation29_spill] sm:$0xff] }
 0x280   :  { %v1035_v59 = vadd.f32 %v1011_v46, %v955_v34  ;;  %v907_v29 = vpop.xlane.xlu1 %906  ;;  %v2887_v40 = vsub.f32 %v2885_v56, %v2886_v12 }
 0x281   :  { %v927_v54 = vadd.f32 %v907_v29, %v863_v1  ;;  %v567_v28 = vmul.f32 1.442695, %v2884_v14  ;;  %v756_v1 = vmul.f32 %v1518_v7, %v740_v60  ;;  %v1520_v46 = vpop.eup %1519  ;;  %v748_v29 = vld [vmem:[#allocation3 + $0x48] sm:$0xff]  ;;  %v741_v7 = vld [vmem:[#allocation3 + $0x10] sm:$0xff] }
 0x282   :  { %1051 = vst.msk [vmem:[#allocation5 + $0x38] sm:$0xff] %vm2861_vm10, %v1035_v59  ;;  %v585_v34 = vmul.f32 1.442695, %v2887_v40  ;;  %v2909_v60 = vld [vmem:[#allocation26_spill] sm:$0xff]  ;;  %vm2912_vm10 = vmmov %vm2869_vm0  ;;  %v750_v40 = vld [vmem:[#allocation3 + $0x58] sm:$0xff] }
 0x283   :  { %943 = vst.msk [vmem:[#allocation4 + $0x58] sm:$0xff] %vm2862_vm6, %v927_v54  ;;  %v1015_v42 = vpop.xlane.xlu0 %1014  ;;  %1527 = vpow2.f32 %v567_v28  ;;  %v2888_v54 = vld [vmem:[#allocation18_spill] sm:$0xff]  ;;  %v2911_v3 = vsub.f32 %v2909_v60, %v2910_v30  ;;  %vm2913_vm6 = vmmov %vm2869_vm0  ;;  %v963_v30 = vld [vmem:[#allocation5 + $0x78] sm:$0xff] }
 0x284   :  { %v1037_v4 = vadd.f32 %v1015_v42, %v957_v63  ;;  %v911_v21 = vpop.xlane.xlu1 %910  ;;  %v2889_v63 = vld [vmem:[#allocation21_spill] sm:$0xff]  ;;  %1529 = vpow2.f32 %v585_v34 }
 0x285   :  { %v929_v53 = vadd.f32 %v911_v21, %v865_v10  ;;  %v2890_v10 = vsub.f32 %v2888_v54, %v2889_v63  ;;  %v1522_v21 = vpop.eup %1521  ;;  %v593_v14 = vmul.f32 1.442695, %v2911_v3 }
 0x286   :  { %1053 = vst.msk [vmem:[#allocation5 + $0x48] sm:$0xff] %vm2863_vm8, %v1037_v4  ;;  %vm2914_vm8 = vmmov %vm2869_vm0 }
 0x287   :  { %945 = vst.msk [vmem:[#allocation4 + $0x68] sm:$0xff] %vm2864_vm1, %v929_v53  ;;  %v1019_v39 = vpop.xlane.xlu0 %1018  ;;  %v583_v42 = vmul.f32 1.442695, %v2890_v10  ;;  %v747_v53 = vld [vmem:[#allocation3 + $0x40] sm:$0xff]  ;;  %vm2915_vm1 = vmmov %vm2869_vm0 }
 0x288   :  { %v1039_v35 = vadd.f32 %v1019_v39, %v959_v36  ;;  %v915_v23 = vpop.xlane.xlu1 %914  ;;  %v2891_v36 = vld [vmem:[#allocation16_spill] sm:$0xff] }
 0x289   :  { %v931_v16 = vadd.f32 %v915_v23, %v867_v8  ;;  %v2892_v8 = vld [vmem:[#allocation19_spill] sm:$0xff]  ;;  %v764_v23 = vmul.f32 %v1520_v46, %v748_v29  ;;  %1531 = vpow2.f32 %v583_v42 }
 0x28a   :  { %1055 = vst.msk [vmem:[#allocation5 + $0x58] sm:$0xff] %vm2865_vm14, %v1039_v35  ;;  %v2893_v39 = vsub.f32 %v2891_v36, %v2892_v8  ;;  %v749_v29 = vld [vmem:[#allocation3 + $0x50] sm:$0xff]  ;;  %vm2917_vm14 = vmmov %vm2869_vm0 }
 0x28b   :  { %947 = vst.msk [vmem:[#allocation4 + $0x78] sm:$0xff] %vm2866_vm15, %v931_v16  ;;  %v1524_v16 = vpop.eup %1523  ;;  %vm2918_vm15 = vmmov %vm2869_vm0 }
 0x28c   :  { %v1001_v24 = vpop.xlane.xlu1 %1000  ;;  %v573_v35 = vmul.f32 1.442695, %v2893_v39  ;;  %v1526_v31 = vpop.eup %1525 }
 0x28d   :  { %v1030_v38 = vadd.f32 %v1001_v24, %v950_v44  ;;  %v739_v24 = vld [vmem:[#allocation3] sm:$0xff]  ;;  %v758_v28 = vmul.f32 %v1526_v31, %v742_v22 }
 0x28e   :  { %1533 = vpow2.f32 %v573_v35 }
 0x28f   :  { %1046 = vst.msk [vmem:[#allocation5 + $0x10] sm:$0xff] %vm2867_vm3, %v1030_v38  ;;  %vm2920_vm3 = vmmov %vm2869_vm0 }
 0x290   :  { %v1005_v43 = vpop.xlane.xlu1 %1004  ;;  %v1528_v55 = vpop.eup %1527 }
 0x291   :  { %v1032_v25 = vadd.f32 %v1005_v43, %v952_v32  ;;  %v763_v32 = vmul.f32 %v1522_v21, %v747_v53  ;;  %v1530_v56 = vpop.eup %1529  ;;  %v744_v21 = vld [vmem:[#allocation3 + $0x28] sm:$0xff] }
 0x292   :  { %v766_v10 = vmul.f32 %v1530_v56, %v750_v40 }
 0x293   :  { %1048 = vst.msk [vmem:[#allocation5 + $0x20] sm:$0xff] %vm2868_vm9, %v1032_v25  ;;  %v2895_v25 = vld [vmem:[#allocation20_spill] sm:$0xff]  ;;  %vm2921_vm9 = vmmov %vm2869_vm0 }
 0x294   :  { %v1009_v15 = vpop.xlane.xlu1 %1008 }
 0x295   :  { %v1034_v47 = vadd.f32 %v1009_v15, %v954_v5  ;;  %v2896_v5 = vld [vmem:[#allocation22_spill] sm:$0xff] }
 0x296   :  { %v2897_v15 = vsub.f32 %v2895_v25, %v2896_v5  ;;  %v1532_v2 = vpop.eup %1531  ;;  %v743_v5 = vld [vmem:[#allocation3 + $0x20] sm:$0xff] }
 0x297   :  { %1050 = vst.msk [vmem:[#allocation5 + $0x30] sm:$0xff] %vm2869_vm0, %v1034_v47  ;;  %v765_v36 = vmul.f32 %v1532_v2, %v749_v29  ;;  %v753_v2 = vld [vmem:[#allocation3 + $0x70] sm:$0xff] }
 0x298   :  { %v1013_v41 = vpop.xlane.xlu1 %1012  ;;  %v589_v47 = vmul.f32 1.442695, %v2897_v15 }
 0x299   :  { %v1036_v52 = vadd.f32 %v1013_v41, %v956_v27  ;;  %v755_v41 = vmul.f32 %v1524_v16, %v739_v24  ;;  %v1095_v24 = vld [vmem:[#allocation2] sm:$0xff] }
 0x29a   :  { %1535 = vpow2.f32 %v589_v47 }
 0x29b   :  { %1052 = vst.msk [vmem:[#allocation5 + $0x40] sm:$0xff] %vm2870_vm11, %v1036_v52  ;;  %v1534_v42 = vpop.eup %1533  ;;  %vm2922_vm11 = vmmov %vm2869_vm0 }
 0x29c   :  { %v1017_v33 = vpop.xlane.xlu1 %1016  ;;  %v760_v35 = vmul.f32 %v1534_v42, %v744_v21 }
 0x29d   :  { %v1038_v57 = vadd.f32 %v1017_v33, %v958_v13  ;;  %v2899_v13 = vld [vmem:[#allocation24_spill] sm:$0xff]  ;;  %v2900_v33 = vld [vmem:[#allocation27_spill] sm:$0xff] }
 0x29f   :  { %1054 = vst.msk [vmem:[#allocation5 + $0x50] sm:$0xff] %vm2871_vm5, %v1038_v57  ;;  %v2901_v57 = vsub.f32 %v2899_v13, %v2900_v33  ;;  %v746_v13 = vld [vmem:[#allocation3 + $0x38] sm:$0xff]  ;;  %v2919_v33 = vsub.f32 %v2346_v0, %v2354_v61  ;;  %vm2923_vm5 = vmmov %vm2869_vm0 }
 0x2a0   :  { %v1021_v11 = vpop.xlane.xlu1 %1020 }
 0x2a1   :  { %v1040_v51 = vadd.f32 %v1021_v11, %v960_v48  ;;  %v571_v48 = vmul.f32 1.442695, %v2901_v57  ;;  %v1063_v11 = vld [vmem:[#allocation5] sm:$0xff]  ;;  %v591_v57 = vmul.f32 1.442695, %v2919_v33 }
 0x2a2   :  { %v1143_v19 = vmax.f32 %v1063_v11, 1.0 }
 0x2a3   :  { %1056 = vst.msk [vmem:[#allocation5 + $0x60] sm:$0xff] %vm2873_vm7, %v1040_v51  ;;  %v2903_v51 = vld [vmem:[#allocation23_spill] sm:$0xff]  ;;  %1537 = vpow2.f32 %v571_v48  ;;  %vm2924_vm7 = vmmov %vm2869_vm0 }
 0x2a4   :  { %v2905_v45 = vsub.f32 %v2903_v51, %v2904_v20 }
 0x2a6   :  { %v577_v18 = vmul.f32 1.442695, %v2905_v45 }
 0x2a8   :  { %1539 = vpow2.f32 %v577_v18 }
 0x2a9   :  { %1541 = vpow2.f32 %v587_v58 }
 0x2aa   :  { %1543 = vrcp.f32 %v1143_v19 }
 0x2ab   :  { %1545 = vpow2.f32 %v593_v14 }
 0x2b5   :  { %v774_v59 = vpop.xlane.xlu0 %773 }
 0x2b6   :  { %v804_v4 = vadd.f32 %v774_v59, %v756_v1  ;;  %v757_v1 = vmul.f32 %v1528_v55, %v741_v7 }
 0x2b8   :  { %821 = vst.msk [vmem:[#allocation3 + $0x8] sm:$0xff] %vm2894_vm13, %v804_v4  ;;  %vm2925_vm13 = vmmov %vm2869_vm0 }
 0x2b9   :  { %v790_v44 = vpop.xlane.xlu0 %789 }
 0x2ba   :  { %v812_v38 = vadd.f32 %v790_v44, %v764_v23  ;;  %v1536_v23 = vpop.eup %1535  ;;  %v752_v44 = vld [vmem:[#allocation3 + $0x68] sm:$0xff] }
 0x2bb   :  { %v788_v43 = vpop.xlane.xlu1 %787  ;;  %v1538_v25 = vpop.eup %1537  ;;  %v768_v15 = vmul.f32 %v1536_v23, %v752_v44 }
 0x2bc   :  { %829 = vst.msk [vmem:[#allocation3 + $0x48] sm:$0xff] %vm2898_vm4, %v812_v38  ;;  %v811_v27 = vadd.f32 %v788_v43, %v763_v32  ;;  %v2916_v38 = vsub.f32 %v2340_v17, %v2344_v37  ;;  %v1540_v47 = vpop.eup %1539  ;;  %v759_v37 = vmul.f32 %v1538_v25, %v743_v5  ;;  %vm2926_vm4 = vmmov %vm2869_vm0 }
 0x2bd   :  { %v772_v52 = vpop.xlane.xlu0 %771  ;;  %v1542_v48 = vpop.eup %1541  ;;  %v762_v18 = vmul.f32 %v1540_v47, %v746_v13 }
 0x2be   :  { %828 = vst.msk [vmem:[#allocation3 + $0x40] sm:$0xff] %vm2902_vm2, %v811_v27  ;;  %v803_v6 = vadd.f32 %v772_v52, %v755_v41  ;;  %v575_v32 = vmul.f32 1.442695, %v2916_v38  ;;  %v1111_v27 = vmul.f32 %v1095_v24, %v1063_v11  ;;  %v1079_v41 = vld [vmem:[#allocation4] sm:$0xff]  ;;  %v1544_v51 = vpop.eup %1543  ;;  %vm2927_vm2 = vmmov %vm2869_vm0 }
 0x2bf   :  { %v1546_v11 = vpop.eup %1545 }
 0x2c0   :  { %820 = vst.msk [vmem:[#allocation3] sm:$0xff] %vm2906_vm12, %v803_v6  ;;  %v1127_v20 = vsub.f32 %v1079_v41, %v1111_v27  ;;  %vm2928_vm12 = vmmov %vm2869_vm0 }
 0x2c1   :  { %v1023_v26 = vpop.xlane.xlu0 %1022 }
 0x2c2   :  { %v1041_v62 = vadd.f32 %v1023_v26, %v961_v49  ;;  %v751_v49 = vld [vmem:[#allocation3 + $0x60] sm:$0xff]  ;;  %v754_v26 = vld [vmem:[#allocation3 + $0x78] sm:$0xff]  ;;  %v1160_v50 = vmul.f32 %v1544_v51, %v1127_v20 }
 0x2c3   :  { %v767_v0 = vmul.f32 %v1542_v48, %v751_v49  ;;  %v770_v55 = vmul.f32 %v1546_v11, %v754_v26 }
 0x2c4   :  { %1057 = vst.msk [vmem:[#allocation5 + $0x68] sm:$0xff] %vm2912_vm10, %v1041_v62 }
 0x2c5   :  { %v778_v12 = vpop.xlane.xlu0 %777 }
 0x2c6   :  { %v806_v34 = vadd.f32 %v778_v12, %v758_v28  ;;  %v745_v12 = vld [vmem:[#allocation3 + $0x30] sm:$0xff] }
 0x2c7   :  { %v1191_v46 = vld [vmem:[#allocation3] sm:$0xff]  ;;  %v776_v59 = vpop.xlane.xlu1 %775 }
 0x2c8   :  { %v1207_v54 = vadd.f32 1e-06, %v1191_v46  ;;  %823 = vst.msk [vmem:[#allocation3 + $0x18] sm:$0xff] %vm2913_vm6, %v806_v34  ;;  %v805_v63 = vadd.f32 %v776_v59, %v757_v1 }
 0x2c9   :  { %v794_v4 = vpop.xlane.xlu0 %793 }
 0x2ca   :  { %1547 = vlog2.f32 %v1207_v54  ;;  %822 = vst.msk [vmem:[#allocation3 + $0x10] sm:$0xff] %vm2914_vm8, %v805_v63  ;;  %v814_v53 = vadd.f32 %v794_v4, %v766_v10  ;;  %v962_v63 = vld [vmem:[#allocation5 + $0x70] sm:$0xff] }
 0x2cb   :  { %v792_v8 = vpop.xlane.xlu1 %791  ;;  %1549 = vpow2.f32 %v575_v32 }
 0x2cc   :  { %831 = vst.msk [vmem:[#allocation3 + $0x58] sm:$0xff] %vm2915_vm1, %v814_v53  ;;  %v813_v39 = vadd.f32 %v792_v8, %v765_v36  ;;  %1551 = vpow2.f32 %v591_v57 }
 0x2cd   :  { %v782_v16 = vpop.xlane.xlu0 %781 }
 0x2ce   :  { %830 = vst.msk [vmem:[#allocation3 + $0x50] sm:$0xff] %vm2917_vm14, %v813_v39  ;;  %v808_v43 = vadd.f32 %v782_v16, %v760_v35 }
 0x2d0   :  { %825 = vst.msk [vmem:[#allocation3 + $0x28] sm:$0xff] %vm2918_vm15, %v808_v43 }
 0x2d1   :  { %v798_v52 = vpop.xlane.xlu0 %797 }
 0x2d2   :  { %v816_v17 = vadd.f32 %v798_v52, %v768_v15 }
 0x2d3   :  { %v780_v6 = vpop.xlane.xlu1 %779 }
 0x2d4   :  { %833 = vst.msk [vmem:[#allocation3 + $0x68] sm:$0xff] %vm2920_vm3, %v816_v17  ;;  %v807_v45 = vadd.f32 %v780_v6, %v759_v37 }
 0x2d5   :  { %v786_v31 = vpop.xlane.xlu0 %785 }
 0x2d6   :  { %824 = vst.msk [vmem:[#allocation3 + $0x20] sm:$0xff] %vm2921_vm9, %v807_v45  ;;  %v810_v22 = vadd.f32 %v786_v31, %v762_v18 }
 0x2d7   :  { %v1548_v61 = vpop.eup %1547  ;;  %v796_v9 = vpop.xlane.xlu1 %795 }
 0x2d8   :  { %v1224_v58 = vmul.f32 0.6931472, %v1548_v61  ;;  %827 = vst.msk [vmem:[#allocation3 + $0x38] sm:$0xff] %vm2869_vm0, %v810_v22  ;;  %v815_v62 = vadd.f32 %v796_v9, %v767_v0  ;;  %v1550_v56 = vpop.eup %1549 }
 0x2d9   :  { %v802_v19 = vpop.xlane.xlu0 %801  ;;  %v761_v40 = vmul.f32 %v1550_v56, %v745_v12  ;;  %v1552_v34 = vpop.eup %1551 }
 0x2da   :  { %v1255_v7 = vsub.f32 %v1160_v50, %v1224_v58  ;;  %832 = vst.msk [vmem:[#allocation3 + $0x60] sm:$0xff] %vm2922_vm11, %v815_v62  ;;  %v818_v60 = vadd.f32 %v802_v19, %v770_v55  ;;  %v769_v59 = vmul.f32 %v1552_v34, %v753_v2 }
 0x2dc   :  { %v1287_v3 = vmul.f32 -1.0, %v1255_v7  ;;  %835 = vst.msk [vmem:[#allocation3 + $0x78] sm:$0xff] %vm2923_vm5, %v818_v60 }
 0x2dd   :  { %v1027_v14 = vpop.xlane.xlu0 %1026 }
 0x2de   :  { %1319 = vst.msk [vmem:[%s2687_s4] sm:$0xff] %vm2924_vm7, %v1287_v3  ;;  %v1043_v28 = vadd.f32 %v1027_v14, %v963_v30 }
 0x2e0   :  { %1059 = vst.msk [vmem:[#allocation5 + $0x78] sm:$0xff] %vm2925_vm13, %v1043_v28 }
 0x2e3   :  { %v784_v1 = vpop.xlane.xlu1 %783 }
 0x2e4   :  { %v809_v46 = vadd.f32 %v784_v1, %v761_v40 }
 0x2e6   :  { %826 = vst.msk [vmem:[#allocation3 + $0x30] sm:$0xff] %vm2926_vm4, %v809_v46 }
 0x2e7   :  { %v800_v29 = vpop.xlane.xlu1 %799 }
 0x2e8   :  { %v817_v54 = vadd.f32 %v800_v29, %v769_v59 }
 0x2ea   :  { %834 = vst.msk [vmem:[#allocation3 + $0x70] sm:$0xff] %vm2927_vm2, %v817_v54 }
 0x2eb   :  { %v1025_v10 = vpop.xlane.xlu1 %1024 }
 0x2ec   :  { %v1042_v42 = vadd.f32 %v1025_v10, %v962_v63 }
 0x2ee   :  { %1058 = vst.msk [vmem:[#allocation5 + $0x70] sm:$0xff] %vm2928_vm12, %v1042_v42 }
 0x2ef   :  { %1339 = vsyncpa [#allocation7], 1 }

</bundles_post_ra>
